<compile_context>
chip_gen: v7x
topology: tpu7x:2x2x1
jax: 0.10.0
libtpu: 0.0.40
codegen_flags: <defaults>
</compile_context>

<pallas_src>
import functools

import jax
import jax.numpy as jnp
from jax import lax
from jax.experimental import pallas as pl
from jax.experimental.pallas import tpu as pltpu


def _make_divisible(v, divisor, min_value=None):
    if min_value is None:
        min_value = divisor
    new_v = max(min_value, int(v + divisor / 2) // divisor * divisor)
    if new_v < 0.9 * v:
        new_v += divisor
    return new_v


_PARAM_ORDER = ('w1bd', 's1t', 'b1t', 'wdwt', 's2t', 'b2t',
                'wfc1bd', 'bfc1t', 'wfc2bd', 'bfc2t', 'w3bd', 's3t', 'b3t')


def _inverted_residual_kernel(
    x_ref, w1_ref, s1_ref, b1_ref, wdw_ref, s2_ref, b2_ref,
    wfc1_ref, bfc1_ref, wfc2_ref, bfc2_ref, w3_ref, s3_ref, b3_ref,
    o_ref, *, H, W, K, Cin, Chid, Cout):
    del Cin, Cout
    P = (K - 1) // 2
    WC = W * Chid
    x2 = x_ref[0]                                    # (H, W*Cin), lane-dense

    # ---- 1x1 expand conv + folded BN + h_swish (x6; the 1/6 is in s2) ----
    # Block-diagonal expand weight keeps the result in the lane-dense
    # (H, W*Chid) layout -> no relayout/reshape around the matmul.
    h = jnp.dot(x2, w1_ref[...], preferred_element_type=jnp.float32)
    h = h * s1_ref[...] + b1_ref[...]
    h = h * jnp.clip(h + 3.0, 0.0, 6.0)              # 6 * h_swish(.)

    # ---- depthwise KxK conv (stride 1, SAME) ----
    # Row shifts: sublane roll + zeroing of the wrapped halo rows.
    # Col shifts: lane roll by kx*Chid; out-of-bounds columns are zeroed via
    # the lane-masked weight tiles (precomputed in the wrapper).
    row_id = lax.broadcasted_iota(jnp.int32, (H, 1), 0)
    wdw = wdw_ref[...]                               # (K*K, W*Chid), loaded once
    acc = None
    for ky in range(K):
        dy = ky - P
        if dy == 0:
            rows = h
        else:
            rows = pltpu.roll(h, shift=(-dy) % H, axis=0)
            rows = jnp.where((row_id + dy >= 0) & (row_id + dy < H), rows, 0.0)
        for kx in range(K):
            dx = kx - P
            shifted = rows if dx == 0 else pltpu.roll(
                rows, shift=(-dx * Chid) % WC, axis=1)
            idx = ky * K + kx
            term = shifted * wdw[idx:idx + 1, :]
            acc = term if acc is None else acc + term
    d = acc * s2_ref[...] + b2_ref[...]              # folded BN (includes 1/6)

    # ---- SE: global avg pool -> FC -> ReLU -> FC -> h_sigmoid -> scale ----
    # Sublane reduce + lane-roll butterfly leaves the pooled vector replicated
    # in every W-group of lanes; block-diagonal FC weights then produce the
    # gate directly in the lane-dense layout (broadcasts over rows).
    colsum = jnp.sum(d, axis=0, keepdims=True)       # (1, W*Chid)
    step = W // 2
    while step >= 1:
        colsum = colsum + pltpu.roll(colsum, shift=step * Chid, axis=1)
        step //= 2
    pooled = colsum * (1.0 / (H * W))                # pooled vec, replicated x W
    y = jnp.dot(pooled, wfc1_ref[...], preferred_element_type=jnp.float32)
    y = jnp.maximum(y + bfc1_ref[...], 0.0)          # (1, W*Cse)
    y = jnp.dot(y, wfc2_ref[...], preferred_element_type=jnp.float32)
    y = jnp.clip(y + bfc2_ref[...] + 3.0, 0.0, 6.0) * (1.0 / 6.0)   # h_sigmoid
    d = d * y                                        # SE gating

    # ---- h_swish (x6; the 1/6 is in s3) + 1x1 project + BN + residual ----
    d = d * jnp.clip(d + 3.0, 0.0, 6.0)
    out = jnp.dot(d, w3_ref[...], preferred_element_type=jnp.float32)
    o_ref[0] = out * s3_ref[...] + b3_ref[...] + x2  # identity residual


def _block_diag(w, reps):
    """(Ci, Co) -> (reps*Ci, reps*Co) block-diagonal replication."""
    ci, co = w.shape
    eye = jnp.eye(reps, dtype=w.dtype)
    return (eye[:, None, :, None] * w[None, :, None, :]).reshape(reps * ci, reps * co)


def _lane_tile(v, reps):
    """(1, C) -> (1, reps*C): v repeated once per spatial column."""
    return jnp.tile(v, (1, reps))


def prepare_kernel_params(p, *, W, K, Chid):
    """Fold the h_swish 1/6 constants into BN scales and re-lay all params
    for the lane-dense (H, W*C) kernel layout (done once, outside the kernel)."""
    P = (K - 1) // 2
    x_idx = jnp.arange(W)
    tiles = []
    for ky in range(K):
        for kx in range(K):
            dx = kx - P
            valid = ((x_idx + dx >= 0) & (x_idx + dx < W)).astype(jnp.float32)
            w_tap = p['wdw'][ky * K + kx]            # (Chid,)
            tiles.append((valid[:, None] * w_tap[None, :]).reshape(1, W * Chid))
    kp = {
        'w1bd': _block_diag(p['w1'], W),
        's1t': _lane_tile(p['s1'], W),
        'b1t': _lane_tile(p['b1'], W),
        'wdwt': jnp.concatenate(tiles, axis=0),      # (K*K, W*Chid), OOB-x masked
        's2t': _lane_tile(p['s2'], W) / 6.0,         # 1/6 of first h_swish folded
        'b2t': _lane_tile(p['b2'], W),
        'wfc1bd': _block_diag(p['wfc1'], W),
        'bfc1t': _lane_tile(p['bfc1'], W),
        'wfc2bd': _block_diag(p['wfc2'], W),
        'bfc2t': _lane_tile(p['bfc2'], W),
        'w3bd': _block_diag(p['w3'], W),
        's3t': _lane_tile(p['s3'], W) / 6.0,         # 1/6 of second h_swish folded
        'b3t': _lane_tile(p['b3'], W),
    }
    return {k: v.astype(jnp.float32) for k, v in kp.items()}


def inverted_residual(x_nhwc, kp, *, H, W, K, Cin, Chid, Cout):
    """Channels-last (NHWC) InvertedResidual forward via a Pallas kernel."""
    assert Cin == Cout, "identity-residual branch requires inp == oup"
    assert W & (W - 1) == 0, "butterfly pooling assumes W is a power of two"
    B = x_nhwc.shape[0]
    x_flat = x_nhwc.reshape(B, H, W * Cin)           # contiguous view, no transpose

    kernel = functools.partial(_inverted_residual_kernel,
                               H=H, W=W, K=K, Cin=Cin, Chid=Chid, Cout=Cout)

    def full_spec(arr):
        return pl.BlockSpec(arr.shape, lambda b: (0,) * arr.ndim)

    grid_spec = pltpu.PrefetchScalarGridSpec(
        num_scalar_prefetch=0,
        grid=(B,),
        in_specs=[pl.BlockSpec((1, H, W * Cin), lambda b: (b, 0, 0))]
                 + [full_spec(kp[k]) for k in _PARAM_ORDER],
        out_specs=pl.BlockSpec((1, H, W * Cout), lambda b: (b, 0, 0)),
    )

    out_flat = pl.pallas_call(
        kernel,
        out_shape=jax.ShapeDtypeStruct((B, H, W * Cout), jnp.float32),
        grid_spec=grid_spec,
        compiler_params=pltpu.CompilerParams(dimension_semantics=("parallel",)),
    )(x_flat, *[kp[k] for k in _PARAM_ORDER])

    return out_flat.reshape(B, H, W, Cout)


# ------------------------- pure-JAX reference --------------------------------
def _hswish(x):
    return x * jnp.clip(x + 3.0, 0.0, 6.0) / 6.0


def _hsigmoid(x):
    return jnp.clip(x + 3.0, 0.0, 6.0) / 6.0


def ref_forward(x_nhwc, p, *, K, Chid):
    """Pure-JAX NHWC reference (uses lax.conv for the depthwise conv)."""
    x = x_nhwc
    B = x.shape[0]
    h = jnp.einsum('bhwc,cd->bhwd', x, p['w1'])
    h = _hswish(h * p['s1'].reshape(1, 1, 1, -1) + p['b1'].reshape(1, 1, 1, -1))
    wdw = p['wdw'].reshape(K, K, 1, Chid)                       # HWIO, depthwise
    d = lax.conv_general_dilated(
        h, wdw, window_strides=(1, 1), padding='SAME',
        dimension_numbers=('NHWC', 'HWIO', 'NHWC'), feature_group_count=Chid)
    d = d * p['s2'].reshape(1, 1, 1, -1) + p['b2'].reshape(1, 1, 1, -1)
    pooled = jnp.mean(d, axis=(1, 2))                           # (B, Chid)
    y = jnp.maximum(pooled @ p['wfc1'] + p['bfc1'], 0.0)
    y = _hsigmoid(y @ p['wfc2'] + p['bfc2'])
    d = d * y.reshape(B, 1, 1, Chid)
    d = _hswish(d)
    out = jnp.einsum('bhwc,cd->bhwd', d, p['w3'])
    out = out * p['s3'].reshape(1, 1, 1, -1) + p['b3'].reshape(1, 1, 1, -1)
    return out + x


if __name__ == "__main__":
    B, Cin, Cout, Chid, K, H, W = 2, 8, 8, 16, 3, 16, 16
    Cse = _make_divisible(Chid // 4, 8)          # SE hidden width (reduction=4)

    key = jax.random.PRNGKey(0)
    ks = jax.random.split(key, 20)

    def bn_fold(kg, kb, km, kv, c, eps=1e-5):
        gamma = jax.random.uniform(kg, (c,), minval=0.5, maxval=1.5)
        beta = 0.1 * jax.random.normal(kb, (c,))
        mean = 0.1 * jax.random.normal(km, (c,))
        var = jax.random.uniform(kv, (c,), minval=0.5, maxval=1.5)
        scale = gamma / jnp.sqrt(var + eps)
        bias = beta - mean * scale
        return (scale.reshape(1, c).astype(jnp.float32),
                bias.reshape(1, c).astype(jnp.float32))

    params = {}
    params['w1'] = (0.2 * jax.random.normal(ks[0], (Cin, Chid))).astype(jnp.float32)
    params['s1'], params['b1'] = bn_fold(ks[1], ks[2], ks[3], ks[4], Chid)
    params['wdw'] = (0.2 * jax.random.normal(ks[5], (K * K, Chid))).astype(jnp.float32)
    params['s2'], params['b2'] = bn_fold(ks[6], ks[7], ks[8], ks[9], Chid)
    params['wfc1'] = (0.2 * jax.random.normal(ks[10], (Chid, Cse))).astype(jnp.float32)
    params['bfc1'] = (0.1 * jax.random.normal(ks[11], (1, Cse))).astype(jnp.float32)
    params['wfc2'] = (0.2 * jax.random.normal(ks[12], (Cse, Chid))).astype(jnp.float32)
    params['bfc2'] = (0.1 * jax.random.normal(ks[13], (1, Chid))).astype(jnp.float32)
    params['w3'] = (0.2 * jax.random.normal(ks[14], (Chid, Cout))).astype(jnp.float32)
    params['s3'], params['b3'] = bn_fold(ks[15], ks[16], ks[17], ks[18], Cout)

    # PyTorch-layout input; converted once to channels-last at the test-harness
    # boundary (the kernel path itself is NHWC-native, no per-call transposes).
    x_nchw = jax.random.normal(ks[19], (B, Cin, H, W), dtype=jnp.float32)
    x_nhwc = jnp.transpose(x_nchw, (0, 2, 3, 1))

    kparams = prepare_kernel_params(params, W=W, K=K, Chid=Chid)

    out = inverted_residual(x_nhwc, kparams, H=H, W=W, K=K,
                            Cin=Cin, Chid=Chid, Cout=Cout)
    out = jax.block_until_ready(out)

    ref = ref_forward(x_nhwc, params, K=K, Chid=Chid)
    assert out.shape == (B, H, W, Cout)
    max_err = float(jnp.max(jnp.abs(out - ref)))
    assert jnp.allclose(out, ref, atol=2e-3, rtol=2e-3), f"max abs err {max_err}"
    print("KERNEL_OK")
</pallas_src>

<mosaic_0001>
module attributes {stable_mosaic.version = 11 : i64} {
  func.func @_inverted_residual_kernel(%arg0: i32, %arg1: memref<1x16x128xf32, #tpu.memory_space<vmem>>, %arg2: memref<128x256xf32, #tpu.memory_space<vmem>>, %arg3: memref<1x256xf32, #tpu.memory_space<vmem>>, %arg4: memref<1x256xf32, #tpu.memory_space<vmem>>, %arg5: memref<9x256xf32, #tpu.memory_space<vmem>>, %arg6: memref<1x256xf32, #tpu.memory_space<vmem>>, %arg7: memref<1x256xf32, #tpu.memory_space<vmem>>, %arg8: memref<256x128xf32, #tpu.memory_space<vmem>>, %arg9: memref<1x128xf32, #tpu.memory_space<vmem>>, %arg10: memref<128x256xf32, #tpu.memory_space<vmem>>, %arg11: memref<1x256xf32, #tpu.memory_space<vmem>>, %arg12: memref<256x128xf32, #tpu.memory_space<vmem>>, %arg13: memref<1x128xf32, #tpu.memory_space<vmem>>, %arg14: memref<1x128xf32, #tpu.memory_space<vmem>>, %arg15: memref<1x16x128xf32, #tpu.memory_space<vmem>>) attributes {dimension_semantics = [#tpu.dimension_semantics<parallel>], iteration_bounds = array<i64: 2>, scalar_prefetch = 0 : i64, scratch_operands = 0 : i64, tpu.core_type = #tpu.core_type<tc>, window_params = [{transform_indices = @transform_0, window_bounds = array<i64: 1, 16, 128>}, {pipeline_mode = #tpu.pipeline_mode<synchronous>, transform_indices = @transform_1, window_bounds = array<i64: 128, 256>}, {pipeline_mode = #tpu.pipeline_mode<synchronous>, transform_indices = @transform_2, window_bounds = array<i64: 1, 256>}, {pipeline_mode = #tpu.pipeline_mode<synchronous>, transform_indices = @transform_3, window_bounds = array<i64: 1, 256>}, {pipeline_mode = #tpu.pipeline_mode<synchronous>, transform_indices = @transform_4, window_bounds = array<i64: 9, 256>}, {pipeline_mode = #tpu.pipeline_mode<synchronous>, transform_indices = @transform_5, window_bounds = array<i64: 1, 256>}, {pipeline_mode = #tpu.pipeline_mode<synchronous>, transform_indices = @transform_6, window_bounds = array<i64: 1, 256>}, {pipeline_mode = #tpu.pipeline_mode<synchronous>, transform_indices = @transform_7, window_bounds = array<i64: 256, 128>}, {pipeline_mode = #tpu.pipeline_mode<synchronous>, transform_indices = @transform_8, window_bounds = array<i64: 1, 128>}, {pipeline_mode = #tpu.pipeline_mode<synchronous>, transform_indices = @transform_9, window_bounds = array<i64: 128, 256>}, {pipeline_mode = #tpu.pipeline_mode<synchronous>, transform_indices = @transform_10, window_bounds = array<i64: 1, 256>}, {pipeline_mode = #tpu.pipeline_mode<synchronous>, transform_indices = @transform_11, window_bounds = array<i64: 256, 128>}, {pipeline_mode = #tpu.pipeline_mode<synchronous>, transform_indices = @transform_12, window_bounds = array<i64: 1, 128>}, {pipeline_mode = #tpu.pipeline_mode<synchronous>, transform_indices = @transform_13, window_bounds = array<i64: 1, 128>}, {transform_indices = @transform_14, window_bounds = array<i64: 1, 16, 128>}]} {
    %c0 = arith.constant 0 : index
    %c0_0 = arith.constant 0 : index
    %c0_1 = arith.constant 0 : index
    %0 = vector.load %arg1[%c0, %c0_0, %c0_1] : memref<1x16x128xf32, #tpu.memory_space<vmem>>, vector<1x16x128xf32>
    %1 = vector.shape_cast %0 : vector<1x16x128xf32> to vector<16x128xf32>
    %c0_2 = arith.constant 0 : index
    %c0_3 = arith.constant 0 : index
    %2 = vector.load %arg2[%c0_2, %c0_3] : memref<128x256xf32, #tpu.memory_space<vmem>>, vector<128x256xf32>
    %cst = arith.constant dense<0.000000e+00> : vector<16x256xf32>
    %3 = tpu.matmul %1, %2, %cst {dimension_numbers = #tpu.dot_dimension_numbers<[1], [0], [0], [1], [0, 0, 1, 1], [], []>} : vector<16x128xf32>, vector<128x256xf32>, vector<16x256xf32> -> vector<16x256xf32>
    %c0_4 = arith.constant 0 : index
    %c0_5 = arith.constant 0 : index
    %4 = vector.load %arg3[%c0_4, %c0_5] : memref<1x256xf32, #tpu.memory_space<vmem>>, vector<1x256xf32>
    %5 = vector.broadcast %4 : vector<1x256xf32> to vector<16x256xf32>
    %6 = arith.mulf %3, %5 : vector<16x256xf32>
    %c0_6 = arith.constant 0 : index
    %c0_7 = arith.constant 0 : index
    %7 = vector.load %arg4[%c0_6, %c0_7] : memref<1x256xf32, #tpu.memory_space<vmem>>, vector<1x256xf32>
    %8 = vector.broadcast %7 : vector<1x256xf32> to vector<16x256xf32>
    %9 = arith.addf %6, %8 : vector<16x256xf32>
    %cst_8 = arith.constant 3.000000e+00 : f32
    %10 = vector.broadcast %cst_8 : f32 to vector<16x256xf32>
    %11 = arith.addf %9, %10 : vector<16x256xf32>
    %cst_9 = arith.constant 0.000000e+00 : f32
    %cst_10 = arith.constant 6.000000e+00 : f32
    %12 = vector.broadcast %cst_9 : f32 to vector<16x256xf32>
    %13 = arith.maximumf %12, %11 : vector<16x256xf32>
    %14 = vector.broadcast %cst_10 : f32 to vector<16x256xf32>
    %15 = arith.minimumf %14, %13 : vector<16x256xf32>
    %16 = arith.mulf %9, %15 : vector<16x256xf32>
    %17 = tpu.iota {dimensions = array<i32: 0>} : vector<16x1xi32>
    %c0_11 = arith.constant 0 : index
    %c0_12 = arith.constant 0 : index
    %18 = vector.load %arg5[%c0_11, %c0_12] : memref<9x256xf32, #tpu.memory_space<vmem>>, vector<9x256xf32>
    %c1_i32 = arith.constant 1 : i32
    %19 = tpu.dynamic_rotate %16 by %c1_i32 dim 0 : vector<16x256xf32>, i32 -> vector<16x256xf32>
    %c-1_i32 = arith.constant -1 : i32
    %20 = vector.broadcast %c-1_i32 : i32 to vector<16x1xi32>
    %21 = arith.addi %17, %20 : vector<16x1xi32>
    %c0_i32 = arith.constant 0 : i32
    %22 = vector.broadcast %c0_i32 : i32 to vector<16x1xi32>
    %23 = arith.cmpi sge, %21, %22 : vector<16x1xi32>
    %c-1_i32_13 = arith.constant -1 : i32
    %24 = vector.broadcast %c-1_i32_13 : i32 to vector<16x1xi32>
    %25 = arith.addi %17, %24 : vector<16x1xi32>
    %c16_i32 = arith.constant 16 : i32
    %26 = vector.broadcast %c16_i32 : i32 to vector<16x1xi32>
    %27 = arith.cmpi slt, %25, %26 : vector<16x1xi32>
    %28 = arith.andi %23, %27 : vector<16x1xi1>
    %cst_14 = arith.constant 0.000000e+00 : f32
    %29 = vector.shape_cast %28 : vector<16x1xi1> to vector<16x1xi1>
    %30 = vector.broadcast %29 : vector<16x1xi1> to vector<16x256xi1>
    %31 = vector.broadcast %cst_14 : f32 to vector<16x256xf32>
    %32 = arith.select %30, %19, %31 : vector<16x256xi1>, vector<16x256xf32>
    %c16_i32_15 = arith.constant 16 : i32
    %33 = tpu.dynamic_rotate %32 by %c16_i32_15 dim 1 : vector<16x256xf32>, i32 -> vector<16x256xf32>
    %34 = vector.extract_strided_slice %18 {offsets = [0, 0], sizes = [1, 256], strides = [1, 1]} : vector<9x256xf32> to vector<1x256xf32>
    %35 = vector.broadcast %34 : vector<1x256xf32> to vector<16x256xf32>
    %36 = arith.mulf %33, %35 : vector<16x256xf32>
    %37 = vector.extract_strided_slice %18 {offsets = [1, 0], sizes = [1, 256], strides = [1, 1]} : vector<9x256xf32> to vector<1x256xf32>
    %38 = vector.broadcast %37 : vector<1x256xf32> to vector<16x256xf32>
    %39 = arith.mulf %32, %38 : vector<16x256xf32>
    %40 = arith.addf %36, %39 : vector<16x256xf32>
    %c240_i32 = arith.constant 240 : i32
    %41 = tpu.dynamic_rotate %32 by %c240_i32 dim 1 : vector<16x256xf32>, i32 -> vector<16x256xf32>
    %42 = vector.extract_strided_slice %18 {offsets = [2, 0], sizes = [1, 256], strides = [1, 1]} : vector<9x256xf32> to vector<1x256xf32>
    %43 = vector.broadcast %42 : vector<1x256xf32> to vector<16x256xf32>
    %44 = arith.mulf %41, %43 : vector<16x256xf32>
    %45 = arith.addf %40, %44 : vector<16x256xf32>
    %c16_i32_16 = arith.constant 16 : i32
    %46 = tpu.dynamic_rotate %16 by %c16_i32_16 dim 1 : vector<16x256xf32>, i32 -> vector<16x256xf32>
    %47 = vector.extract_strided_slice %18 {offsets = [3, 0], sizes = [1, 256], strides = [1, 1]} : vector<9x256xf32> to vector<1x256xf32>
    %48 = vector.broadcast %47 : vector<1x256xf32> to vector<16x256xf32>
    %49 = arith.mulf %46, %48 : vector<16x256xf32>
    %50 = arith.addf %45, %49 : vector<16x256xf32>
    %51 = vector.extract_strided_slice %18 {offsets = [4, 0], sizes = [1, 256], strides = [1, 1]} : vector<9x256xf32> to vector<1x256xf32>
    %52 = vector.broadcast %51 : vector<1x256xf32> to vector<16x256xf32>
    %53 = arith.mulf %16, %52 : vector<16x256xf32>
    %54 = arith.addf %50, %53 : vector<16x256xf32>
    %c240_i32_17 = arith.constant 240 : i32
    %55 = tpu.dynamic_rotate %16 by %c240_i32_17 dim 1 : vector<16x256xf32>, i32 -> vector<16x256xf32>
    %56 = vector.extract_strided_slice %18 {offsets = [5, 0], sizes = [1, 256], strides = [1, 1]} : vector<9x256xf32> to vector<1x256xf32>
    %57 = vector.broadcast %56 : vector<1x256xf32> to vector<16x256xf32>
    %58 = arith.mulf %55, %57 : vector<16x256xf32>
    %59 = arith.addf %54, %58 : vector<16x256xf32>
    %c15_i32 = arith.constant 15 : i32
    %60 = tpu.dynamic_rotate %16 by %c15_i32 dim 0 : vector<16x256xf32>, i32 -> vector<16x256xf32>
    %c1_i32_18 = arith.constant 1 : i32
    %61 = vector.broadcast %c1_i32_18 : i32 to vector<16x1xi32>
    %62 = arith.addi %17, %61 : vector<16x1xi32>
    %c0_i32_19 = arith.constant 0 : i32
    %63 = vector.broadcast %c0_i32_19 : i32 to vector<16x1xi32>
    %64 = arith.cmpi sge, %62, %63 : vector<16x1xi32>
    %c1_i32_20 = arith.constant 1 : i32
    %65 = vector.broadcast %c1_i32_20 : i32 to vector<16x1xi32>
    %66 = arith.addi %17, %65 : vector<16x1xi32>
    %c16_i32_21 = arith.constant 16 : i32
    %67 = vector.broadcast %c16_i32_21 : i32 to vector<16x1xi32>
    %68 = arith.cmpi slt, %66, %67 : vector<16x1xi32>
    %69 = arith.andi %64, %68 : vector<16x1xi1>
    %cst_22 = arith.constant 0.000000e+00 : f32
    %70 = vector.shape_cast %69 : vector<16x1xi1> to vector<16x1xi1>
    %71 = vector.broadcast %70 : vector<16x1xi1> to vector<16x256xi1>
    %72 = vector.broadcast %cst_22 : f32 to vector<16x256xf32>
    %73 = arith.select %71, %60, %72 : vector<16x256xi1>, vector<16x256xf32>
    %c16_i32_23 = arith.constant 16 : i32
    %74 = tpu.dynamic_rotate %73 by %c16_i32_23 dim 1 : vector<16x256xf32>, i32 -> vector<16x256xf32>
    %75 = vector.extract_strided_slice %18 {offsets = [6, 0], sizes = [1, 256], strides = [1, 1]} : vector<9x256xf32> to vector<1x256xf32>
    %76 = vector.broadcast %75 : vector<1x256xf32> to vector<16x256xf32>
    %77 = arith.mulf %74, %76 : vector<16x256xf32>
    %78 = arith.addf %59, %77 : vector<16x256xf32>
    %79 = vector.extract_strided_slice %18 {offsets = [7, 0], sizes = [1, 256], strides = [1, 1]} : vector<9x256xf32> to vector<1x256xf32>
    %80 = vector.broadcast %79 : vector<1x256xf32> to vector<16x256xf32>
    %81 = arith.mulf %73, %80 : vector<16x256xf32>
    %82 = arith.addf %78, %81 : vector<16x256xf32>
    %c240_i32_24 = arith.constant 240 : i32
    %83 = tpu.dynamic_rotate %73 by %c240_i32_24 dim 1 : vector<16x256xf32>, i32 -> vector<16x256xf32>
    %84 = vector.extract_strided_slice %18 {offsets = [8, 0], sizes = [1, 256], strides = [1, 1]} : vector<9x256xf32> to vector<1x256xf32>
    %85 = vector.broadcast %84 : vector<1x256xf32> to vector<16x256xf32>
    %86 = arith.mulf %83, %85 : vector<16x256xf32>
    %87 = arith.addf %82, %86 : vector<16x256xf32>
    %c0_25 = arith.constant 0 : index
    %c0_26 = arith.constant 0 : index
    %88 = vector.load %arg6[%c0_25, %c0_26] : memref<1x256xf32, #tpu.memory_space<vmem>>, vector<1x256xf32>
    %89 = vector.broadcast %88 : vector<1x256xf32> to vector<16x256xf32>
    %90 = arith.mulf %87, %89 : vector<16x256xf32>
    %c0_27 = arith.constant 0 : index
    %c0_28 = arith.constant 0 : index
    %91 = vector.load %arg7[%c0_27, %c0_28] : memref<1x256xf32, #tpu.memory_space<vmem>>, vector<1x256xf32>
    %92 = vector.broadcast %91 : vector<1x256xf32> to vector<16x256xf32>
    %93 = arith.addf %90, %92 : vector<16x256xf32>
    %cst_29 = arith.constant dense<0.000000e+00> : vector<256xf32>
    %94 = vector.multi_reduction <add>, %93, %cst_29 [0] : vector<16x256xf32> to vector<256xf32>
    %95 = vector.shape_cast %94 : vector<256xf32> to vector<1x256xf32>
    %c128_i32 = arith.constant 128 : i32
    %96 = tpu.dynamic_rotate %95 by %c128_i32 dim 1 : vector<1x256xf32>, i32 -> vector<1x256xf32>
    %97 = arith.addf %95, %96 : vector<1x256xf32>
    %c64_i32 = arith.constant 64 : i32
    %98 = tpu.dynamic_rotate %97 by %c64_i32 dim 1 : vector<1x256xf32>, i32 -> vector<1x256xf32>
    %99 = arith.addf %97, %98 : vector<1x256xf32>
    %c32_i32 = arith.constant 32 : i32
    %100 = tpu.dynamic_rotate %99 by %c32_i32 dim 1 : vector<1x256xf32>, i32 -> vector<1x256xf32>
    %101 = arith.addf %99, %100 : vector<1x256xf32>
    %c16_i32_30 = arith.constant 16 : i32
    %102 = tpu.dynamic_rotate %101 by %c16_i32_30 dim 1 : vector<1x256xf32>, i32 -> vector<1x256xf32>
    %103 = arith.addf %101, %102 : vector<1x256xf32>
    %cst_31 = arith.constant 3.906250e-03 : f32
    %104 = vector.broadcast %cst_31 : f32 to vector<1x256xf32>
    %105 = arith.mulf %103, %104 : vector<1x256xf32>
    %c0_32 = arith.constant 0 : index
    %c0_33 = arith.constant 0 : index
    %106 = vector.load %arg8[%c0_32, %c0_33] : memref<256x128xf32, #tpu.memory_space<vmem>>, vector<256x128xf32>
    %cst_34 = arith.constant dense<0.000000e+00> : vector<1x128xf32>
    %107 = tpu.matmul %105, %106, %cst_34 {dimension_numbers = #tpu.dot_dimension_numbers<[1], [0], [0], [1], [0, 0, 1, 1], [], []>} : vector<1x256xf32>, vector<256x128xf32>, vector<1x128xf32> -> vector<1x128xf32>
    %c0_35 = arith.constant 0 : index
    %c0_36 = arith.constant 0 : index
    %108 = vector.load %arg9[%c0_35, %c0_36] : memref<1x128xf32, #tpu.memory_space<vmem>>, vector<1x128xf32>
    %109 = arith.addf %107, %108 : vector<1x128xf32>
    %cst_37 = arith.constant 0.000000e+00 : f32
    %110 = vector.broadcast %cst_37 : f32 to vector<1x128xf32>
    %111 = arith.maximumf %109, %110 : vector<1x128xf32>
    %c0_38 = arith.constant 0 : index
    %c0_39 = arith.constant 0 : index
    %112 = vector.load %arg10[%c0_38, %c0_39] : memref<128x256xf32, #tpu.memory_space<vmem>>, vector<128x256xf32>
    %cst_40 = arith.constant dense<0.000000e+00> : vector<1x256xf32>
    %113 = tpu.matmul %111, %112, %cst_40 {dimension_numbers = #tpu.dot_dimension_numbers<[1], [0], [0], [1], [0, 0, 1, 1], [], []>} : vector<1x128xf32>, vector<128x256xf32>, vector<1x256xf32> -> vector<1x256xf32>
    %c0_41 = arith.constant 0 : index
    %c0_42 = arith.constant 0 : index
    %114 = vector.load %arg11[%c0_41, %c0_42] : memref<1x256xf32, #tpu.memory_space<vmem>>, vector<1x256xf32>
    %115 = arith.addf %113, %114 : vector<1x256xf32>
    %cst_43 = arith.constant 3.000000e+00 : f32
    %116 = vector.broadcast %cst_43 : f32 to vector<1x256xf32>
    %117 = arith.addf %115, %116 : vector<1x256xf32>
    %cst_44 = arith.constant 0.000000e+00 : f32
    %cst_45 = arith.constant 6.000000e+00 : f32
    %118 = vector.broadcast %cst_44 : f32 to vector<1x256xf32>
    %119 = arith.maximumf %118, %117 : vector<1x256xf32>
    %120 = vector.broadcast %cst_45 : f32 to vector<1x256xf32>
    %121 = arith.minimumf %120, %119 : vector<1x256xf32>
    %cst_46 = arith.constant 0.166666672 : f32
    %122 = vector.broadcast %cst_46 : f32 to vector<1x256xf32>
    %123 = arith.mulf %121, %122 : vector<1x256xf32>
    %124 = vector.broadcast %123 : vector<1x256xf32> to vector<16x256xf32>
    %125 = arith.mulf %93, %124 : vector<16x256xf32>
    %cst_47 = arith.constant 3.000000e+00 : f32
    %126 = vector.broadcast %cst_47 : f32 to vector<16x256xf32>
    %127 = arith.addf %125, %126 : vector<16x256xf32>
    %cst_48 = arith.constant 0.000000e+00 : f32
    %cst_49 = arith.constant 6.000000e+00 : f32
    %128 = vector.broadcast %cst_48 : f32 to vector<16x256xf32>
    %129 = arith.maximumf %128, %127 : vector<16x256xf32>
    %130 = vector.broadcast %cst_49 : f32 to vector<16x256xf32>
    %131 = arith.minimumf %130, %129 : vector<16x256xf32>
    %132 = arith.mulf %125, %131 : vector<16x256xf32>
    %c0_50 = arith.constant 0 : index
    %c0_51 = arith.constant 0 : index
    %133 = vector.load %arg12[%c0_50, %c0_51] : memref<256x128xf32, #tpu.memory_space<vmem>>, vector<256x128xf32>
    %cst_52 = arith.constant dense<0.000000e+00> : vector<16x128xf32>
    %134 = tpu.matmul %132, %133, %cst_52 {dimension_numbers = #tpu.dot_dimension_numbers<[1], [0], [0], [1], [0, 0, 1, 1], [], []>} : vector<16x256xf32>, vector<256x128xf32>, vector<16x128xf32> -> vector<16x128xf32>
    %c0_53 = arith.constant 0 : index
    %c0_54 = arith.constant 0 : index
    %135 = vector.load %arg13[%c0_53, %c0_54] : memref<1x128xf32, #tpu.memory_space<vmem>>, vector<1x128xf32>
    %136 = vector.broadcast %135 : vector<1x128xf32> to vector<16x128xf32>
    %137 = arith.mulf %134, %136 : vector<16x128xf32>
    %c0_55 = arith.constant 0 : index
    %c0_56 = arith.constant 0 : index
    %138 = vector.load %arg14[%c0_55, %c0_56] : memref<1x128xf32, #tpu.memory_space<vmem>>, vector<1x128xf32>
    %139 = vector.broadcast %138 : vector<1x128xf32> to vector<16x128xf32>
    %140 = arith.addf %137, %139 : vector<16x128xf32>
    %141 = arith.addf %140, %1 : vector<16x128xf32>
    %c0_57 = arith.constant 0 : index
    %c0_58 = arith.constant 0 : index
    %c0_59 = arith.constant 0 : index
    %142 = vector.load %arg15[%c0_57, %c0_58, %c0_59] : memref<1x16x128xf32, #tpu.memory_space<vmem>>, vector<1x16x128xf32>
    %143 = vector.shape_cast %142 : vector<1x16x128xf32> to vector<16x128xf32>
    %144 = vector.shape_cast %141 : vector<16x128xf32> to vector<1x16x128xf32>
    tpu.vector_store %arg15[%c0_57, %c0_58, %c0_59], %144 {strides = array<i32>} : memref<1x16x128xf32, #tpu.memory_space<vmem>>, vector<1x16x128xf32>,
    return
  }
  func.func @transform_0(%arg0: i32) -> (i32, i32, i32) {
    %c0_i32 = arith.constant 0 : i32
    %c0_i32_0 = arith.constant 0 : i32
    %c0_i32_1 = arith.constant 0 : i32
    return %arg0, %c0_i32, %c0_i32_0 : i32, i32, i32
  }
  func.func @transform_1(%arg0: i32) -> (i32, i32) {
    %c0_i32 = arith.constant 0 : i32
    %c0_i32_0 = arith.constant 0 : i32
    %c0_i32_1 = arith.constant 0 : i32
    return %c0_i32, %c0_i32_0 : i32, i32
  }
  func.func @transform_2(%arg0: i32) -> (i32, i32) {
    %c0_i32 = arith.constant 0 : i32
    %c0_i32_0 = arith.constant 0 : i32
    %c0_i32_1 = arith.constant 0 : i32
    return %c0_i32, %c0_i32_0 : i32, i32
  }
  func.func @transform_3(%arg0: i32) -> (i32, i32) {
    %c0_i32 = arith.constant 0 : i32
    %c0_i32_0 = arith.constant 0 : i32
    %c0_i32_1 = arith.constant 0 : i32
    return %c0_i32, %c0_i32_0 : i32, i32
  }
  func.func @transform_4(%arg0: i32) -> (i32, i32) {
    %c0_i32 = arith.constant 0 : i32
    %c0_i32_0 = arith.constant 0 : i32
    %c0_i32_1 = arith.constant 0 : i32
    return %c0_i32, %c0_i32_0 : i32, i32
  }
  func.func @transform_5(%arg0: i32) -> (i32, i32) {
    %c0_i32 = arith.constant 0 : i32
    %c0_i32_0 = arith.constant 0 : i32
    %c0_i32_1 = arith.constant 0 : i32
    return %c0_i32, %c0_i32_0 : i32, i32
  }
  func.func @transform_6(%arg0: i32) -> (i32, i32) {
    %c0_i32 = arith.constant 0 : i32
    %c0_i32_0 = arith.constant 0 : i32
    %c0_i32_1 = arith.constant 0 : i32
    return %c0_i32, %c0_i32_0 : i32, i32
  }
  func.func @transform_7(%arg0: i32) -> (i32, i32) {
    %c0_i32 = arith.constant 0 : i32
    %c0_i32_0 = arith.constant 0 : i32
    %c0_i32_1 = arith.constant 0 : i32
    return %c0_i32, %c0_i32_0 : i32, i32
  }
  func.func @transform_8(%arg0: i32) -> (i32, i32) {
    %c0_i32 = arith.constant 0 : i32
    %c0_i32_0 = arith.constant 0 : i32
    %c0_i32_1 = arith.constant 0 : i32
    return %c0_i32, %c0_i32_0 : i32, i32
  }
  func.func @transform_9(%arg0: i32) -> (i32, i32) {
    %c0_i32 = arith.constant 0 : i32
    %c0_i32_0 = arith.constant 0 : i32
    %c0_i32_1 = arith.constant 0 : i32
    return %c0_i32, %c0_i32_0 : i32, i32
  }
  func.func @transform_10(%arg0: i32) -> (i32, i32) {
    %c0_i32 = arith.constant 0 : i32
    %c0_i32_0 = arith.constant 0 : i32
    %c0_i32_1 = arith.constant 0 : i32
    return %c0_i32, %c0_i32_0 : i32, i32
  }
  func.func @transform_11(%arg0: i32) -> (i32, i32) {
    %c0_i32 = arith.constant 0 : i32
    %c0_i32_0 = arith.constant 0 : i32
    %c0_i32_1 = arith.constant 0 : i32
    return %c0_i32, %c0_i32_0 : i32, i32
  }
  func.func @transform_12(%arg0: i32) -> (i32, i32) {
    %c0_i32 = arith.constant 0 : i32
    %c0_i32_0 = arith.constant 0 : i32
    %c0_i32_1 = arith.constant 0 : i32
    return %c0_i32, %c0_i32_0 : i32, i32
  }
  func.func @transform_13(%arg0: i32) -> (i32, i32) {
    %c0_i32 = arith.constant 0 : i32
    %c0_i32_0 = arith.constant 0 : i32
    %c0_i32_1 = arith.constant 0 : i32
    return %c0_i32, %c0_i32_0 : i32, i32
  }
  func.func @transform_14(%arg0: i32) -> (i32, i32, i32) {
    %c0_i32 = arith.constant 0 : i32
    %c0_i32_0 = arith.constant 0 : i32
    %c0_i32_1 = arith.constant 0 : i32
    return %arg0, %c0_i32, %c0_i32_0 : i32, i32, i32
  }
}

</mosaic_0001>

<bundles_post_ra>
// kernel: tpu_custom_call.1
= control target key start
LH: loop header
LB: loop body
LE: loop exit
PB: predicated region body
PF: predicated region fallthrough
CT: control target
= control target key end

     0   :  { %s2876_s0 = inlined_call_operand.hbm [shape: f32[2,16,128], index: 0, kind: input, shape index: {}]   ;;  %s2877_s1 = inlined_call_operand.hbm [shape: f32[128,256], index: 1, kind: input, shape index: {}]   ;;  %s2878_s2 = inlined_call_operand.vmem [shape: f32[1,256], index: 2, kind: input, shape index: {}]   ;;  %s2879_s3 = inlined_call_operand.vmem [shape: f32[1,256], index: 3, kind: input, shape index: {}]   ;;  %s2880_s4 = inlined_call_operand.hbm [shape: f32[9,256], index: 4, kind: input, shape index: {}]   ;;  %s2881_s5 = inlined_call_operand.vmem [shape: f32[1,256], index: 5, kind: input, shape index: {}]   ;;  %s2882_s6 = inlined_call_operand.vmem [shape: f32[1,256], index: 6, kind: input, shape index: {}]   ;;  %s2883_s7 = inlined_call_operand.hbm [shape: f32[256,128], index: 7, kind: input, shape index: {}]   ;;  %s2884_s8 = inlined_call_operand.vmem [shape: f32[1,128], index: 8, kind: input, shape index: {}]   ;;  %s2885_s9 = inlined_call_operand.hbm [shape: f32[128,256], index: 9, kind: input, shape index: {}]   ;;  %s2886_s10 = inlined_call_operand.vmem [shape: f32[1,256], index: 10, kind: input, shape index: {}]   ;;  %s2887_s11 = inlined_call_operand.hbm [shape: f32[256,128], index: 11, kind: input, shape index: {}]   ;;  %s2888_s12 = inlined_call_operand.vmem [shape: f32[1,128], index: 12, kind: input, shape index: {}]   ;;  %s2889_s13 = inlined_call_operand.vmem [shape: f32[1,128], index: 13, kind: input, shape index: {}]   ;;  %s2890_s14 = inlined_call_operand.hbm [shape: f32[2,16,128], index: 14, kind: output, shape index: {}]  }
   0x1   :  { %2901 = sst [smem:[#allocation19_spill]] %s2877_s1 }
   0x2   :  { %2902 = sst [smem:[#allocation20_spill]] %s2880_s4 }
   0x3   :  { %2903 = sst [smem:[#allocation21_spill]] %s2882_s6 }
   0x4   :  { %2904 = sst [smem:[#allocation22_spill]] %s2884_s8 }
   0x5   :  { %2905 = sst [smem:[#allocation23_spill]] %s2886_s10 }
   0x6   :  { %2906 = sst [smem:[#allocation24_spill]] %s2888_s12 }
   0x7   :  { %2907 = sst [smem:[#allocation25_spill]] %s2889_s13 }
   0x8   :  { %2908 = sst [smem:[#allocation26_spill]] %s2890_s14 }
   0x9   :  { %19 = vsyncpa [#allocation3], 0 }
   0xa   :  { %21 = vsyncpa [#allocation3 + $0x1], 0 }
   0xb   :  { %22 = vsyncpa [#allocation6], 0 }
   0xc   :  { %23 = vsyncpa [#allocation9], 0 }
   0xd   :  { %24 = vsyncpa [#allocation12], 0 }
   0xe   :  { %25 = vsyncpa [#allocation4], 0 }
   0xf   :  { %27 = vsyncpa [#allocation4 + $0x1], 0  ;;  %s2251_s29 = smov 0   ;;  %s2253_s30 = smov 0  }
  0x10   :  { %s2255_s15 = smov 0   ;;  %s2257_s16 = smov 0  }
  0x11 LB: > { %s2158_s17 = smov [#allocation5]   ;;  %s2272_s19 = sadd.s32 4294967295, %s2156_s16   ;;  %s2156_s16 = sphi %s2257_s16, %s2941_s16   ;;  %s2152_s15 = sphi %s2255_s15, %s2940_s15   ;;  %s2148_s30 = sphi %s2253_s30, %s2939_s30   ;;  %s2144_s29 = sphi %s2251_s29, %s2938_s29  }
  0x12   : > { %s375_s18 = sshll.u32 %s2158_s17, 4  ;;  %p1568_p0 = scmp.ge.s32.totalorder %s2156_s16, 1  ;;  %s2277_s18 = int_to_ptr.vmem [resolvable:$true] %s375_s18 }
  0x13   : > { %p2894_p1 = scmp.eq.s32.totalorder %s2272_s19, 0  ;;  %p363_p2 = scmp.lt.s32.totalorder %s2156_s16, 3 }
  0x14   : > { %s2159_s21 = smov [#allocation8]   ;;  %s2160_s24 = smov [#allocation7]  }
  0x15   : > { %p2279_p3 = pnand %p1568_p0, %p363_p2  ;;  %s413_s22 = sshll.u32 %s2159_s21, 4  ;;  %s2292_s22 = int_to_ptr.vmem [resolvable:$true] %s413_s22 }
  0x16   : > { %s2294_s25 = sshll.u32 %s2160_s24, 4  ;;  %s2911_s1 = sld [smem:[#allocation19_spill]]  ;;  %s395_s25 = int_to_ptr.vmem [resolvable:$true] %s2294_s25 }
  0x17   : > { %s2909_s20 = scalar_select %p2279_p3, 1, 0 }
  0x18   : > { %p1822_p5 = pneg %p2279_p3 }
  0x1a   : > { %p2288_p6 = pnand %p1822_p5, %p2894_p1 }
  0x1c   : > { %s1908_s28 = scalar_lea.hbm %s2911_s1, 4096  ;;  %p2304_p8 = pneg %p2288_p6 }
  0x1d   : > { %p1909_p7 = scmp.ne.s32.totalorder %s2911_s1, %s1908_s28  ;;  %p1915_p11 = scmp.lt.u32.totalorder %s1908_s28, %s2911_s1 }
  0x1f   : > { %p1911_p9 = pnand %p2304_p8, %p1909_p7 }
  0x21   : > { %p1912_p10 = pneg %p1911_p9 }
  0x23   : > { %p1917_p12 = pnand %p1915_p11, %p1912_p10 }
  0x25   : > { %1920 = shalt.err (!%p1917_p12)
}
  0x26   : > { %s1921_s14 = scalar_lea.vmem %s2277_s18, 4096  ;;  %p1929_p5 = scmp.lt.s32.totalorder %s2277_s18, %s2277_s18 }
  0x27   : > { %p1922_p13 = scmp.ne.s32.totalorder %s2277_s18, %s1921_s14  ;;  %p1930_p4 = scmp.lt.s32.totalorder %s1921_s14, %s1921_s14 }
  0x29   : > { %p1924_p0 = pnand %p1922_p13, %p2304_p8  ;;  %p1931_p7 = por %p1930_p4, %p1929_p5 }
  0x2b   : > { %p1925_p2 = pneg %p1924_p0 }
  0x2d   : > { %p1932_p9 = pnand %p1931_p7, %p1925_p2 }
  0x2f   : > { %1935 = shalt.err (!%p1932_p9)
}
  0x30   : > { %s2892_s26 = smov 256   ;;  %s2162_s13 = smov 16  }
  0x31   : > { %1825 = dma.hbm_to_vmem [thread:$0]  (!%p2288_p6), %s2911_s1, 4096, %s2277_s18, [#allocation6], %s2892_s26, %s2892_s26, %s2162_s13  }
  0x32   : > { %s1936_s14 = scalar_lea.hbm %s2883_s7, 4096 }
  0x33   : > { %p1937_p4 = scmp.ne.s32.totalorder %s2883_s7, %s1936_s14  ;;  %p1943_p12 = scmp.lt.u32.totalorder %s1936_s14, %s2883_s7 }
  0x35   : > { %p1939_p10 = pnand %p1937_p4, %p2304_p8 }
  0x37   : > { %p1940_p11 = pneg %p1939_p10 }
  0x39   : > { %p1945_p13 = pnand %p1943_p12, %p1940_p11 }
  0x3b   : > { %1948 = shalt.err (!%p1945_p13)
}
  0x3c   : > { %s1949_s18 = scalar_lea.vmem %s2292_s22, 4096  ;;  %p1957_p7 = scmp.lt.s32.totalorder %s2292_s22, %s2292_s22 }
  0x3d   : > { %p1950_p0 = scmp.ne.s32.totalorder %s2292_s22, %s1949_s18  ;;  %p1958_p9 = scmp.lt.s32.totalorder %s1949_s18, %s1949_s18 }
  0x3f   : > { %p1952_p2 = pnand %p1950_p0, %p2304_p8  ;;  %p1959_p4 = por %p1958_p9, %p1957_p7 }
  0x41   : > { %p1953_p5 = pneg %p1952_p2 }
  0x43   : > { %p1960_p10 = pnand %p1959_p4, %p1953_p5 }
  0x45   : > { %1963 = shalt.err (!%p1960_p10)
}
  0x46   : > { %s2896_s10 = smov 128   ;;  %s2898_s6 = smov 8  }
  0x47   : > { %1831 = dma.hbm_to_vmem [thread:$0]  (!%p2288_p6), %s2883_s7, 4096, %s2292_s22, [#allocation9], %s2896_s10, %s2896_s10, %s2898_s6  }
  0x48   : > { %s2913_s4 = sld [smem:[#allocation20_spill]] }
  0x4e   : > { %s1964_s17 = scalar_lea.hbm %s2913_s4, 512 }
  0x4f   : > { %p1965_p11 = scmp.ne.s32.totalorder %s2913_s4, %s1964_s17  ;;  %p1971_p0 = scmp.lt.u32.totalorder %s1964_s17, %s2913_s4 }
  0x51   : > { %p1967_p12 = pnand %p1965_p11, %p2304_p8 }
  0x53   : > { %p1968_p13 = pneg %p1967_p12 }
  0x55   : > { %p1973_p2 = pnand %p1971_p0, %p1968_p13 }
  0x57   : > { %1976 = shalt.err (!%p1973_p2)
}
  0x58   : > { %s1977_s8 = scalar_lea.vmem %s395_s25, 512  ;;  %p1985_p4 = scmp.lt.s32.totalorder %s395_s25, %s395_s25 }
  0x59   : > { %p1978_p5 = scmp.ne.s32.totalorder %s395_s25, %s1977_s8  ;;  %p1986_p10 = scmp.lt.s32.totalorder %s1977_s8, %s1977_s8 }
  0x5b   : > { %p1980_p7 = pnand %p1978_p5, %p2304_p8  ;;  %p1987_p1 = por %p1986_p10, %p1985_p4 }
  0x5d   : > { %p1981_p9 = pneg %p1980_p7 }
  0x5f   : > { %p1988_p3 = pnand %p1987_p1, %p1981_p9 }
  0x61   : > { %1991 = shalt.err (!%p1988_p3)
}
  0x62   : > { %s2914_s22 = smov 256   ;;  %s2165_s27 = smov [#allocation10]  }
  0x63   : > { %1828 = dma.hbm_to_vmem [thread:$0]  (!%p2288_p6), %s2913_s4, 512, %s395_s25, [#allocation6], %s2914_s22, %s2914_s22, %s2162_s13  }
  0x64   : > { %s429_s28 = sshll.u32 %s2165_s27, 4  ;;  %s2166_s17 = smov [#allocation11]   ;;  %s430_s28 = int_to_ptr.vmem [resolvable:$true] %s429_s28 }
  0x65   : > { %s445_s24 = sshll.u32 %s2166_s17, 4  ;;  %s1992_s8 = scalar_lea.hbm %s2885_s9, 4096  ;;  %s446_s24 = int_to_ptr.vmem [resolvable:$true] %s445_s24 }
  0x66   : > { %p1993_p1 = scmp.ne.s32.totalorder %s2885_s9, %s1992_s8  ;;  %p1999_p12 = scmp.lt.u32.totalorder %s1992_s8, %s2885_s9 }
  0x68   : > { %p1995_p3 = pnand %p1993_p1, %p2304_p8 }
  0x6a   : > { %p1996_p11 = pneg %p1995_p3 }
  0x6c   : > { %p2001_p13 = pnand %p1999_p12, %p1996_p11 }
  0x6e   : > { %2004 = shalt.err (!%p2001_p13)
}
  0x6f   : > { %s2005_s25 = scalar_lea.vmem %s430_s28, 4096  ;;  %p2013_p7 = scmp.lt.s32.totalorder %s430_s28, %s430_s28 }
  0x70   : > { %p2006_p0 = scmp.ne.s32.totalorder %s430_s28, %s2005_s25  ;;  %p2014_p9 = scmp.lt.s32.totalorder %s2005_s25, %s2005_s25 }
  0x72   : > { %p2008_p2 = pnand %p2006_p0, %p2304_p8  ;;  %p2015_p4 = por %p2014_p9, %p2013_p7 }
  0x74   : > { %p2009_p5 = pneg %p2008_p2 }
  0x76   : > { %p2016_p10 = pnand %p2015_p4, %p2009_p5 }
  0x78   : > { %2019 = shalt.err (!%p2016_p10)
}
  0x79   : > { %1834 = dma.hbm_to_vmem [thread:$0]  (!%p2288_p6), %s2885_s9, 4096, %s430_s28, [#allocation9], %s2914_s22, %s2914_s22, %s2162_s13  }
  0x7a   : > { %s2020_s27 = scalar_lea.hbm %s2887_s11, 4096 }
  0x7b   : > { %p2021_p1 = scmp.ne.s32.totalorder %s2887_s11, %s2020_s27  ;;  %p2027_p12 = scmp.lt.u32.totalorder %s2020_s27, %s2887_s11 }
  0x7d   : > { %p2023_p3 = pnand %p2021_p1, %p2304_p8 }
  0x7f   : > { %p2024_p11 = pneg %p2023_p3 }
  0x81   : > { %p2029_p13 = pnand %p2027_p12, %p2024_p11 }
  0x83   : > { %2032 = shalt.err (!%p2029_p13)
}
  0x84   : > { %s2033_s26 = scalar_lea.vmem %s446_s24, 4096  ;;  %p2041_p7 = scmp.lt.s32.totalorder %s446_s24, %s446_s24 }
  0x85   : > { %p2034_p0 = scmp.ne.s32.totalorder %s446_s24, %s2033_s26  ;;  %p2042_p9 = scmp.lt.s32.totalorder %s2033_s26, %s2033_s26 }
  0x87   : > { %p2036_p2 = pnand %p2034_p0, %p2304_p8  ;;  %p2043_p4 = por %p2042_p9, %p2041_p7 }
  0x89   : > { %p2037_p5 = pneg %p2036_p2 }
  0x8b   : > { %p2044_p10 = pnand %p2043_p4, %p2037_p5 }
  0x8d   : > { %2047 = shalt.err (!%p2044_p10)
}
  0x8e   : > { %s2915_s13 = smov 8   ;;  %s2916_s22 = smov 128  }
  0x8f   : > { %1837 = dma.hbm_to_vmem [thread:$0]  (!%p2288_p6), %s2887_s11, 4096, %s446_s24, [#allocation12], %s2916_s22, %s2916_s22, %s2915_s13  }
  0x90   : > { %s1567_s23 = sadd.s32 4294967294, %s2156_s16   ;;  %s2420_s21 = sadd.s32 1, %s2156_s16  }
  0x91   : > { %s40_s1 = sadd.s32 1, %s2152_s15  ;;  %s37_s10 = ssub.s32 %s2156_s16, %s2420_s21 }
  0x92   : > { %p47_p8 = scmp.ne.s32.totalorder %s2152_s15, %s2148_s30  ;;  %p38_p1 = scmp.eq.s32.totalorder %s37_s10, 0 }
  0x93   : > { %p48_p3 = scmp.eq.s32.totalorder %s2156_s16, 0  ;;  %p53_p11 = scmp.ne.s32.totalorder %s2148_s30, %s2144_s29 }
  0x94   : > { %p350_p12 = scmp.eq.s32.totalorder %s2272_s19, 1  ;;  %p2917_p0 = scmp.eq.s32.totalorder %s2272_s19, 0 }
  0x95   : > { %s2432_s6 = scalar_select %p38_p1, %s2152_s15, %s40_s1  }
  0x96   : > { %p49_p13 = por %p48_p3, %p47_p8  ;;  %p2436_p2 = por %p2917_p0, %p53_p11 }
  0x97   : > { %p2440_p6 = por %p350_p12, %p47_p8  ;;  %p356_p5 = scmp.eq.s32.totalorder %s1567_s23, 1 }
  0x98   : > { %p1851_p7 = scmp.lt.s32.totalorder %s2156_s16, 2  ;;  %s465_s27 = sand.u32 1, %s2152_s15  }
  0x99   : > { %s2919_s24 = scalar_select %p2440_p6, 1, 0 }
  0x9a   : > { %p2446_p9 = por %p356_p5, %p53_p11  ;;  %s1575_s14 = sshll.u32 %s465_s27, 4 }
  0x9b   : > { %s1595_s18 = sshll.u32 %s2156_s16, 8  ;;  %s469_s25 = scalar_lea.vmem [#allocation2], %s1575_s14 }
  0x9c   : > { %s2920_s17 = scalar_select %p2446_p9, 1, 0 }
  0x9d   : > { %s2454_s28 = scalar_lea.hbm %s2876_s0, %s1595_s18  ;;  %s476_s1 = sshll.u32 %s469_s25, 4  ;;  %s2460_s1 = int_to_ptr.vmem [resolvable:$true] %s476_s1 }
  0x9e   : > { %p2456_p4 = pnand %p1851_p7, %p49_p13  ;;  %s2462_s10 = scalar_lea.sflag [#allocation3], %s465_s27 }
  0x9f   : > { %s2048_s4 = scalar_lea.hbm %s2454_s28, 256  ;;  %s2053_s8 = scalar_lea.hbm %s2876_s0, 512 }
  0xa0   : > { %p2049_p10 = scmp.ne.s32.totalorder %s2454_s28, %s2048_s4  ;;  %p2050_p8 = pneg %p2456_p4 }
  0xa1   : > { %p2054_p11 = scmp.lt.u32.totalorder %s2454_s28, %s2876_s0  ;;  %p2055_p12 = scmp.lt.u32.totalorder %s2053_s8, %s2048_s4 }
  0xa2   : > { %p2051_p1 = pnand %p2050_p8, %p2049_p10  ;;  %p2057_p0 = scmp.lt.u32.totalorder %s2048_s4, %s2454_s28 }
  0xa3   : > { %p2056_p13 = por %p2055_p12, %p2054_p11 }
  0xa4   : > { %p2052_p3 = pneg %p2051_p1 }
  0xa5   : > { %p2058_p5 = por %p2057_p0, %p2056_p13 }
  0xa7   : > { %p2059_p7 = pnand %p2058_p5, %p2052_p3 }
  0xa9   : > { %2062 = shalt.err (!%p2059_p7)
}
  0xaa   : > { %s2063_s27 = scalar_lea.vmem %s2460_s1, 256  ;;  %s2167_s14 = smov [#allocation2]  }
  0xab   : > { %p2064_p10 = scmp.ne.s32.totalorder %s2460_s1, %s2063_s27  ;;  %s2068_s18 = sshll.u32 %s2167_s14, 4  ;;  %s2069_s18 = int_to_ptr.vmem [resolvable:$false] %s2068_s18 }
  0xac   : > { %s2070_s26 = scalar_lea.vmem %s2069_s18, 512  ;;  %p2071_p6 = scmp.lt.s32.totalorder %s2460_s1, %s2069_s18 }
  0xad   : > { %p2066_p1 = pnand %p2064_p10, %p2050_p8  ;;  %p2072_p11 = scmp.lt.s32.totalorder %s2070_s26, %s2063_s27 }
  0xaf   : > { %p2067_p9 = pneg %p2066_p1  ;;  %p2073_p12 = por %p2072_p11, %p2071_p6 }
  0xb1   : > { %p2074_p13 = pnand %p2073_p12, %p2067_p9 }
  0xb3   : > { %2077 = shalt.err (!%p2074_p13)
}
  0xb4   : > { %1841 = dma.hbm_to_vmem [thread:$0]  (!%p2456_p4), %s2454_s28, 256, %s2460_s1, %s2462_s10, %s2916_s22, %s2916_s22, %s2915_s13  }
  0xb5   : > { %p2922_p8 = scmp.ne.s32.totalorder %s2909_s20, 0 }
  0xb6   : > { %s2496_s4 = sand.u32 (!%p2922_p8), 1, %s2148_s30  }
  0xb7   : > { %488 = sbr.rel (%p2922_p8) target bundleno = 1698 (0x6a2), region = 76  ;;  %s1579_s8 = sshll.u32 (!%p2922_p8), %s2496_s4, 4 }
  0xb8   : > { %s491_s25 = scalar_lea.sflag (!%p2922_p8), [#allocation3], %s2496_s4  ;;  %s2502_s23 = scalar_lea.vmem (!%p2922_p8), [#allocation2], %s1579_s8 }
  0xbe   : > { %2123 = dma.done.wait (%p2436_p2), %s491_s25, 256  }
  0xbf   : > { %2125 = vsyncadd (%p2436_p2), %s491_s25, 4294967040  ;;  %p2923_p6 = scmp.eq.s32.totalorder %s2272_s19, 0 }
  0xc1   : > { %2127 = dma.done.wait (%p2923_p6), [#allocation6], 4608   ;;  %p2924_p9 = pmov %p2923_p6 }
  0xc2   : > { %p2925_p4 = pmov %p2923_p6 }
  0xc3   : > { %2129 = vsyncadd (%p2924_p9), [#allocation6], 4294962688 }
  0xc4   : > { %2131 = dma.done.wait (%p2925_p4), [#allocation9], 8192   ;;  %p2926_p3 = pmov %p2925_p4 }
  0xc6   : > { %2133 = vsyncadd (%p2926_p3), [#allocation9], 4294959104  ;;  %p2927_p0 = pmov %p2926_p3 }
  0xc8   : > { %2135 = dma.done.wait (%p2927_p0), [#allocation12], 4096   ;;  %p2928_p5 = pmov %p2927_p0 }
  0xc9   : > { %v2168_v0 = vmov 0.0   ;;  %v562_v1 = vld [vmem:[#allocation5 + $0x8] sm:$0xff]  ;;  %v564_v2 = vld [vmem:[#allocation5 + $0x18] sm:$0xff]  ;;  %v561_v3 = vld [vmem:[#allocation5] sm:$0xff]  ;;  %v672_v51 = vlaneseq  ;;  %s2169_s28 = smov 16   ;;  %s2170_s1 = smov 112  }
  0xca   : > { %2137 = vsyncadd (%p2928_p5), [#allocation12], 4294963200  ;;  %657 = vmatprep.mubr.f32.mxu0 %v2168_v0  ;;  %v1670_v4 = vpack.c.bf16 %v564_v2, %v562_v1  ;;  %v563_v5 = vld [vmem:[#allocation5 + $0x10] sm:$0xff]  ;;  %v566_v6 = vld [vmem:[#allocation5 + $0x28] sm:$0xff]  ;;  %s2929_s26 = sld [smem:[#allocation21_spill]]  ;;  %s2171_s25 = smov 64  }
  0xcb   : > { %v568_v7 = vld [vmem:[#allocation5 + $0x38] sm:$0xff]  ;;  %v1672_v8 = vpack.c.bf16 %v563_v5, %v561_v3  ;;  %v565_v10 = vld [vmem:[#allocation5 + $0x20] sm:$0xff]  ;;  %v567_v11 = vld [vmem:[#allocation5 + $0x30] sm:$0xff]  ;;  %v2526_v52 = vshrl.u32 %v672_v51, 7  ;;  %s2172_s20 = smov 32   ;;  %s2930_s12 = sld [smem:[#allocation22_spill]] }
  0xcc   : > { %v1674_v9 = vpack.c.bf16 %v568_v7, %v566_v6  ;;  %v570_v12 = vld [vmem:[#allocation5 + $0x48] sm:$0xff]  ;;  %1671 = vmatprep.subr.bf16.mxu0 %v1670_v4  ;;  %v572_v13 = vld [vmem:[#allocation5 + $0x58] sm:$0xff]  ;;  %v1676_v14 = vpack.c.bf16 %v567_v11, %v565_v10  ;;  %v569_v16 = vld [vmem:[#allocation5 + $0x40] sm:$0xff]  ;;  %s2931_s10 = sld [smem:[#allocation23_spill]]  ;;  %s2932_s18 = sld [smem:[#allocation24_spill]] }
  0xcd   : > { %1673 = vmatpush1.bf16.msra.mxu0 %v1672_v8  ;;  %v1678_v15 = vpack.c.bf16 %v572_v13, %v570_v12  ;;  %v571_v17 = vld [vmem:[#allocation5 + $0x50] sm:$0xff]  ;;  %v574_v18 = vld [vmem:[#allocation5 + $0x68] sm:$0xff]  ;;  %v576_v19 = vld [vmem:[#allocation5 + $0x78] sm:$0xff]  ;;  %v2529_v53 = vsub.s32 0, %v2526_v52  ;;  %v2535_v55 = vsub.s32 1, %v2526_v52  ;;  %vm729_vm0 = vcmp.lt.s32.totalorder %v2526_v52, 1 }
  0xce   : > { %1675 = vmatprep.subr.bf16.mxu0 %v1674_v9  ;;  %v1680_v20 = vpack.c.bf16 %v571_v17, %v569_v16  ;;  %v1682_v21 = vpack.c.bf16 %v576_v19, %v574_v18  ;;  %v573_v22 = vld [vmem:[#allocation5 + $0x60] sm:$0xff]  ;;  %v575_v23 = vld [vmem:[#allocation5 + $0x70] sm:$0xff]  ;;  %v578_v24 = vld [vmem:[#allocation5 + $0x88] sm:$0xff]  ;;  %vm898_vm1 = vcmp.lt.s32.totalorder %v2526_v52, 7  ;;  %s558_s13 = scalar_lea.vmem [#allocation13], %s1579_s8  ;;  %s1433_s14 = scalar_lea.sflag [#allocation4], %s2496_s4 }
  0xcf   : > { %v580_v25 = vld [vmem:[#allocation5 + $0x98] sm:$0xff]  ;;  %v1684_v26 = vpack.c.bf16 %v575_v23, %v573_v22  ;;  %v577_v28 = vld [vmem:[#allocation5 + $0x80] sm:$0xff]  ;;  %v579_v29 = vld [vmem:[#allocation5 + $0x90] sm:$0xff]  ;;  %s1446_s22 = sshll.u32 %s558_s13, 4  ;;  %p2935_p7 = scmp.ne.s32.totalorder %s2919_s24, 0  ;;  %s2831_s22 = int_to_ptr.vmem [resolvable:$true] %s1446_s22 }
  0xd0   : > { %v1686_v27 = vpack.c.bf16 %v580_v25, %v578_v24  ;;  %v582_v30 = vld [vmem:[#allocation5 + $0xa8] sm:$0xff]  ;;  %v584_v31 = vld [vmem:[#allocation5 + $0xb8] sm:$0xff]  ;;  %v1688_v32 = vpack.c.bf16 %v579_v29, %v577_v28  ;;  %v581_v34 = vld [vmem:[#allocation5 + $0xa0] sm:$0xff]  ;;  %s2078_s8 = scalar_lea.vmem %s2831_s22, 256 }
  0xd1   : > { %1677 = vmatpush1.bf16.msra.mxu0 %v1676_v14  ;;  %v1690_v33 = vpack.c.bf16 %v584_v31, %v582_v30  ;;  %v583_v35 = vld [vmem:[#allocation5 + $0xb0] sm:$0xff]  ;;  %v586_v36 = vld [vmem:[#allocation5 + $0xc8] sm:$0xff]  ;;  %v588_v37 = vld [vmem:[#allocation5 + $0xd8] sm:$0xff]  ;;  %p2079_p2 = scmp.ne.s32.totalorder %s2831_s22, %s2078_s8 }
  0xd2   : > { %1679 = vmatprep.subr.bf16.mxu0 %v1678_v15  ;;  %v1692_v38 = vpack.c.bf16 %v583_v35, %v581_v34  ;;  %v1694_v39 = vpack.c.bf16 %v588_v37, %v586_v36  ;;  %v585_v40 = vld [vmem:[#allocation5 + $0xc0] sm:$0xff]  ;;  %v587_v41 = vld [vmem:[#allocation5 + $0xd0] sm:$0xff]  ;;  %v590_v42 = vld [vmem:[#allocation5 + $0xe8] sm:$0xff] }
  0xd3   : > { %v592_v43 = vld [vmem:[#allocation5 + $0xf8] sm:$0xff]  ;;  %v1696_v44 = vpack.c.bf16 %v587_v41, %v585_v40  ;;  %v589_v46 = vld [vmem:[#allocation5 + $0xe0] sm:$0xff]  ;;  %v591_v47 = vld [vmem:[#allocation5 + $0xf0] sm:$0xff]  ;;  %v734_v41 = vadd.s32 4294967295, %v2526_v52  ;;  %p2080_p10 = pnand %p2079_p2, %p2935_p7 }
  0xd4   : > { %v1698_v45 = vpack.c.bf16 %v592_v43, %v590_v42  ;;  %v1700_v48 = vpack.c.bf16 %v591_v47, %v589_v46  ;;  %v559_v49 = vld [vmem:[%s2502_s23] sm:$0xff]  ;;  %v560_v50 = vld [vmem:[%s2502_s23 + $0x8] sm:$0xff]  ;;  %v720_v43 = vadd.s32 8, %v2526_v52 }
  0xd5   : > { %1681 = vmatpush1.bf16.msra.mxu0 %v1680_v20  ;;  %v670_v54 = vld [vmem:[%s2878_s2] sm:$0x3]  ;;  %vm736_vm2 = vcmp.ge.s32.totalorder %v734_v41, 0  ;;  %p2081_p1 = pneg %p2080_p10 }
  0xd6   : > { %1683 = vmatprep.subr.bf16.mxu0 %v1682_v21  ;;  %v686_v56 = vld [vmem:[%s2879_s3] sm:$0x3]  ;;  %v675_v57 = vrot.slane %v670_v54, %v2529_v53  ;;  %v679_v58 = vrot.slane %v670_v54, %v2535_v55 }
  0xd7   : > { %v691_v59 = vrot.slane %v686_v56, %v2529_v53  ;;  %v695_v61 = vrot.slane %v686_v56, %v2535_v55 }
  0xd9   : > { %1685 = vmatpush1.bf16.msra.mxu0 %v1684_v26 }
  0xda   : > { %1687 = vmatprep.subr.bf16.mxu0 %v1686_v27 }
  0xdd   : > { %1689 = vmatpush1.bf16.msra.mxu0 %v1688_v32 }
  0xde   : > { %1691 = vmatprep.subr.bf16.mxu0 %v1690_v33 }
  0xe1   : > { %1693 = vmatpush1.bf16.msra.mxu0 %v1692_v38 }
  0xe2   : > { %1695 = vmatprep.subr.bf16.mxu0 %v1694_v39 }
  0xe5   : > { %1697 = vmatpush1.bf16.msra.mxu0 %v1696_v44  ;;  %v904_v44 = vadd.s32 1, %v720_v43 }
  0xe6   : > { %1699 = vmatprep.subr.bf16.mxu0 %v1698_v45 }
  0xe7   : > { %vm908_vm3 = vcmp.lt.s32.totalorder %v904_v44, 16 }
  0xe9   : > { %1701 = vmatpush1.bf16.msra.mxu0 %v1700_v48 }
  0xec   : > { %658 = vmatmul.mubr.f32.vlgmr.msra.gmra.mrb[0].mxu0 %v559_v49 }
  0xed   : > { %663 = vmatprep.mubr.f32.mxu0 %v2168_v0 }
  0xf0   : > { %664 = vmatmul.mubr.f32.gmra.mrb[2].mxu0 %v560_v50 }
  0xf1   : > { %1260 = vmatprep.mubr.f32.mxu0 %v2168_v0 }
 0x1bf   : > { %v659_v60 = vpop.f32.mrb[0].mxu0 }
 0x1c0   : > { %v682_v62 = vmul.f32 %v675_v57, %v659_v60  ;;  %v661_v63 = vpop.f32.mrb[1].mxu0 }
 0x1c1   : > { %v683_v0 = vmul.f32 %v679_v58, %v661_v63 }
 0x1c2   : > { %v698_v1 = vadd.f32 %v691_v59, %v682_v62 }
 0x1c3   : > { %v699_v2 = vadd.f32 %v695_v61, %v683_v0  ;;  %v665_v3 = vpop.f32.mrb[2].mxu0  ;;  %v2661_v0 = vld [vmem:[#allocation7] sm:$0xff] }
 0x1c4   : > { %v702_v4 = vadd.f32 3.0, %v698_v1  ;;  %v684_v5 = vmul.f32 %v675_v57, %v665_v3  ;;  %v667_v6 = vpop.f32.mrb[3].mxu0  ;;  %v768_v3 = vrot.slane %v2661_v0, %v2529_v53 }
 0x1c5   : > { %v703_v7 = vadd.f32 3.0, %v699_v2  ;;  %v685_v8 = vmul.f32 %v679_v58, %v667_v6  ;;  %v836_v6 = vsub.s32 3, %v2526_v52 }
 0x1c6   : > { %v706_v9 = vmax.f32 %v702_v4, 0.0  ;;  %v700_v10 = vadd.f32 %v691_v59, %v684_v5  ;;  %v808_v5 = vsub.s32 2, %v2526_v52 }
 0x1c7   : > { %v707_v11 = vmax.f32 %v703_v7, 0.0  ;;  %v701_v12 = vadd.f32 %v695_v61, %v685_v8  ;;  %v2657_v61 = vand.u32 127, %v672_v51  ;;  %v949_v51 = vsub.s32 7, %v2526_v52 }
 0x1c8   : > { %v710_v13 = vmin.f32 %v706_v9, 6.0  ;;  %v704_v14 = vadd.f32 3.0, %v700_v10  ;;  %v780_v7 = vrot.slane %v2661_v0, %v2535_v55 }
 0x1c9   : > { %v711_v15 = vmin.f32 %v707_v11, 6.0  ;;  %v705_v16 = vadd.f32 3.0, %v701_v12  ;;  %vm760_vm4 = vcmp.lt.s32.totalorder %v2657_v61, 16  ;;  %vm801_vm5 = vcmp.lt.s32.totalorder %v2657_v61, 112 }
 0x1ca   : > { %v2544_v17 = vmul.f32 %v710_v13, %v698_v1  ;;  %v708_v18 = vmax.f32 %v704_v14, 0.0  ;;  %v2663_v1 = vld [vmem:[#allocation7 + $0x8] sm:$0xff] }
 0x1cb   : > { %v709_v19 = vmax.f32 %v705_v16, 0.0  ;;  %v2548_v21 = vmul.f32 %v711_v15, %v699_v2  ;;  %v852_v2 = vsub.s32 4, %v2526_v52  ;;  %v772_v4 = vrot.slane %v2663_v1, %v2529_v53 }
 0x1cc   : > { %v712_v20 = vmin.f32 %v708_v18, 6.0  ;;  %822 = vrot.lane.b32.xlu0 %v2544_v17, %s2169_s28  ;;  %v725_v25 = vrot.slane %v2544_v17, 7  ;;  %v894_v27 = vrot.slane %v2544_v17, 1  ;;  %v784_v8 = vrot.slane %v2663_v1, %v2535_v55 }
 0x1cd   : > { %v713_v22 = vmin.f32 %v709_v19, 6.0  ;;  %v726_v29 = vrot.slane %v2548_v21, 7  ;;  %v895_v37 = vrot.slane %v2548_v21, 1  ;;  %v853_v13 = vrot.slane %v2661_v0, %v852_v2 }
 0x1ce   : > { %v2550_v23 = vmul.f32 %v712_v20, %v700_v10  ;;  %v809_v16 = vrot.slane %v2661_v0, %v808_v5  ;;  %v813_v18 = vrot.slane %v2663_v1, %v808_v5  ;;  %v2686_v19 = vrot.slane %v2661_v0, %v949_v51 }
 0x1cf   : > { %v2552_v24 = vmul.f32 %v713_v22, %v701_v12  ;;  %v837_v20 = vrot.slane %v2661_v0, %v836_v6  ;;  %v880_v22 = vsub.s32 5, %v2526_v52  ;;  %v2704_v41 = vrot.slane %v2663_v1, %v949_v51 }
 0x1d0   : > { %866 = vrot.lane.b32.xlu0 %v2544_v17, %s2170_s1  ;;  %824 = vrot.lane.b32.xlu1 %v2550_v23, %s2169_s28  ;;  %v727_v26 = vrot.slane %v2550_v23, 7  ;;  %v896_v28 = vrot.slane %v2550_v23, 1  ;;  %v933_v51 = vsub.s32 6, %v2526_v52 }
 0x1d1   : > { %v728_v30 = vrot.slane %v2552_v24, 7  ;;  %v897_v31 = vrot.slane %v2552_v24, 1  ;;  %v881_v43 = vrot.slane %v2661_v0, %v880_v22  ;;  %v885_v44 = vrot.slane %v2663_v1, %v880_v22 }
 0x1d2   : > { %v2569_v32 = vsel %vm729_vm0, %v725_v25, %v727_v26  ;;  %v2573_v33 = vsel %vm898_vm1, %v894_v27, %v896_v28  ;;  %v732_v34 = vsel %vm729_vm0, %v727_v26, %v725_v25  ;;  %v901_v35 = vsel %vm898_vm1, %v896_v28, %v894_v27 }
 0x1d3   : > { %v2581_v36 = vsel %vm729_vm0, %v726_v29, %v728_v30  ;;  %v733_v38 = vsel %vm729_vm0, %v728_v30, %v726_v29  ;;  %v2592_v39 = vsel %vm898_vm1, %v895_v37, %v897_v31  ;;  %v902_v40 = vsel %vm898_vm1, %v897_v31, %v895_v37 }
 0x1d4   : > { %826 = vrot.lane.b32.xlu0 %v2548_v21, %s2169_s28  ;;  %868 = vrot.lane.b32.xlu1 %v2550_v23, %s2170_s1  ;;  %v2609_v42 = vsel %vm736_vm2, %v732_v34, 0.0  ;;  %v2620_v45 = vsel %vm736_vm2, %v733_v38, 0.0  ;;  %v2626_v46 = vsel %vm908_vm3, %v901_v35, 0.0  ;;  %v2636_v47 = vsel %vm908_vm3, %v902_v40, 0.0 }
 0x1d5   : > { %v857_v25 = vrot.slane %v2663_v1, %v852_v2  ;;  %v787_v26 = vmul.f32 %v780_v7, %v2569_v32  ;;  %v788_v27 = vmul.f32 %v784_v8, %v2581_v36  ;;  %v841_v28 = vrot.slane %v2663_v1, %v836_v6 }
 0x1d8   : > { %870 = vrot.lane.b32.xlu0 %v2548_v21, %s2170_s1  ;;  %828 = vrot.lane.b32.xlu1 %v2552_v24, %s2169_s28 }
 0x1dc   : > { %752 = vrot.lane.b32.xlu0 %v2569_v32, %s2169_s28  ;;  %872 = vrot.lane.b32.xlu1 %v2552_v24, %s2170_s1 }
 0x1e0   : > { %919 = vrot.lane.b32.xlu0 %v2573_v33, %s2169_s28  ;;  %795 = vrot.lane.b32.xlu1 %v2569_v32, %s2170_s1 }
 0x1e4   : > { %750 = vrot.lane.b32.xlu0 %v2609_v42, %s2169_s28  ;;  %756 = vrot.lane.b32.xlu1 %v2581_v36, %s2169_s28 }
 0x1e8   : > { %793 = vrot.lane.b32.xlu0 %v2609_v42, %s2170_s1  ;;  %799 = vrot.lane.b32.xlu1 %v2581_v36, %s2170_s1 }
 0x1ec   : > { %797 = vrot.lane.b32.xlu0 %v2620_v45, %s2170_s1  ;;  %754 = vrot.lane.b32.xlu1 %v2620_v45, %s2169_s28 }
 0x1f0   : > { %923 = vrot.lane.b32.xlu0 %v2592_v39, %s2169_s28  ;;  %921 = vrot.lane.b32.xlu1 %v2626_v46, %s2169_s28 }
 0x1f4   : > { %963 = vrot.lane.b32.xlu0 %v2573_v33, %s2170_s1  ;;  %965 = vrot.lane.b32.xlu1 %v2626_v46, %s2170_s1 }
 0x1f8   : > { %967 = vrot.lane.b32.xlu0 %v2592_v39, %s2170_s1  ;;  %925 = vrot.lane.b32.xlu1 %v2636_v47, %s2169_s28 }
 0x1fc   : > { %969 = vrot.lane.b32.xlu1 %v2636_v47, %s2170_s1 }
 0x23e   : > { %v2644_v48 = vpop.permute.xlu0 %822 }
 0x242   : > { %v2646_v49 = vpop.permute.xlu0 %866  ;;  %v825_v50 = vpop.permute.xlu1 %824 }
 0x246   : > { %v2648_v54 = vpop.permute.xlu0 %826  ;;  %v2650_v56 = vpop.permute.xlu1 %868 }
 0x247   : > { %v830_v52 = vsel %vm760_vm4, %v2644_v48, %v2648_v54 }
 0x24a   : > { %v2652_v57 = vpop.permute.xlu0 %870  ;;  %v829_v58 = vpop.permute.xlu1 %828 }
 0x24b   : > { %v831_v31 = vsel %vm760_vm4, %v825_v50, %v829_v58  ;;  %v833_v34 = vsel %vm760_vm4, %v829_v58, %v825_v50 }
 0x24c   : > { %v844_v50 = vmul.f32 %v837_v20, %v833_v34  ;;  %v845_v58 = vmul.f32 %v841_v28, %v831_v31 }
 0x24e   : > { %v753_v59 = vpop.permute.xlu0 %752  ;;  %v2654_v60 = vpop.permute.xlu1 %872 }
 0x252   : > { %v2659_v62 = vpop.permute.xlu0 %919  ;;  %v796_v63 = vpop.permute.xlu1 %795 }
 0x256   : > { %v751_v9 = vpop.permute.xlu0 %750  ;;  %v757_v10 = vpop.permute.xlu1 %756 }
 0x257   : > { %v762_v11 = vsel %vm760_vm4, %v753_v59, %v757_v10  ;;  %v764_v12 = vsel %vm760_vm4, %v757_v10, %v753_v59  ;;  %v860_v59 = vmul.f32 %v853_v13, %v2550_v23 }
 0x258   : > { %v775_v14 = vmul.f32 %v768_v3, %v764_v12  ;;  %v776_v15 = vmul.f32 %v772_v4, %v762_v11  ;;  %v861_v12 = vmul.f32 %v857_v25, %v2552_v24  ;;  %v832_v24 = vsel %vm760_vm4, %v2648_v54, %v2644_v48 }
 0x259   : > { %v874_v54 = vsel %vm801_vm5, %v2646_v49, %v2652_v57 }
 0x25a   : > { %v794_v29 = vpop.permute.xlu0 %793  ;;  %v800_v30 = vpop.permute.xlu1 %799  ;;  %v791_v37 = vadd.f32 %v787_v26, %v775_v14  ;;  %v792_v36 = vadd.f32 %v788_v27, %v776_v15  ;;  %v785_v26 = vmul.f32 %v780_v7, %v2609_v42  ;;  %v786_v27 = vmul.f32 %v784_v8, %v2620_v45 }
 0x25b   : > { %v803_v35 = vsel %vm801_vm5, %v796_v63, %v800_v30  ;;  %v805_v32 = vsel %vm801_vm5, %v800_v30, %v796_v63  ;;  %v934_v8 = vrot.slane %v2661_v0, %v933_v51  ;;  %v877_v0 = vsel %vm801_vm5, %v2654_v60, %v2650_v56 }
 0x25c   : > { %v816_v38 = vmul.f32 %v809_v16, %v803_v35  ;;  %v817_v40 = vmul.f32 %v813_v18, %v805_v32 }
 0x25e   : > { %v820_v2 = vadd.f32 %v816_v38, %v791_v37  ;;  %v821_v5 = vadd.f32 %v817_v40, %v792_v36  ;;  %v798_v6 = vpop.permute.xlu0 %797  ;;  %v755_v10 = vpop.permute.xlu1 %754  ;;  %v938_v37 = vrot.slane %v2663_v1, %v933_v51  ;;  %v842_v36 = vmul.f32 %v837_v20, %v832_v24  ;;  %v1586_v51 = vld [vmem:[#allocation7 + $0x10] ss:$0 sm:$0xff] }
 0x25f   : > { %v761_v63 = vsel %vm760_vm4, %v751_v9, %v755_v10  ;;  %v763_v11 = vsel %vm760_vm4, %v755_v10, %v751_v9  ;;  %v802_v23 = vsel %vm801_vm5, %v794_v29, %v798_v6  ;;  %v804_v22 = vsel %vm801_vm5, %v798_v6, %v794_v29 }
 0x260   : > { %v848_v14 = vadd.f32 %v844_v50, %v820_v2  ;;  %v849_v15 = vadd.f32 %v845_v58, %v821_v5  ;;  %v773_v30 = vmul.f32 %v768_v3, %v763_v11  ;;  %v774_v31 = vmul.f32 %v772_v4, %v761_v63 }
 0x261   : > { %v814_v32 = vmul.f32 %v809_v16, %v802_v23  ;;  %v815_v42 = vmul.f32 %v813_v18, %v804_v22  ;;  %v858_v3 = vmul.f32 %v853_v13, %v2544_v17  ;;  %v859_v4 = vmul.f32 %v857_v25, %v2548_v21  ;;  %v991_v22 = vld [vmem:[%s2881_s5] sm:$0x3] }
 0x262   : > { %v924_v9 = vpop.permute.xlu0 %923  ;;  %v922_v34 = vpop.permute.xlu1 %921  ;;  %v864_v35 = vadd.f32 %v860_v59, %v848_v14  ;;  %v865_v29 = vadd.f32 %v861_v12, %v849_v15  ;;  %v789_v7 = vadd.f32 %v785_v26, %v773_v30  ;;  %v790_v45 = vadd.f32 %v786_v27, %v774_v31 }
 0x263   : > { %v843_v38 = vmul.f32 %v841_v28, %v830_v52  ;;  %v876_v17 = vsel %vm801_vm5, %v2652_v57, %v2646_v49  ;;  %v875_v21 = vsel %vm801_vm5, %v2650_v56, %v2654_v60  ;;  %v927_v20 = vsel %vm760_vm4, %v2659_v62, %v924_v9 }
 0x264   : > { %v818_v40 = vadd.f32 %v814_v32, %v789_v7  ;;  %v819_v48 = vadd.f32 %v815_v42, %v790_v45  ;;  %v929_v49 = vsel %vm760_vm4, %v924_v9, %v2659_v62  ;;  %v955_v57 = vmul.f32 %v2686_v19, %v2573_v33  ;;  %v1587_v62 = vld [vmem:[#allocation7 + $0x18] ss:$0 sm:$0xff]  ;;  %v1007_v45 = vld [vmem:[%s2929_s26] sm:$0x3] }
 0x265   : > { %v956_v25 = vmul.f32 %v2704_v41, %v2592_v39  ;;  %v886_v28 = vmul.f32 %v881_v43, %v874_v54  ;;  %v887_v56 = vmul.f32 %v885_v44, %v876_v17  ;;  %v888_v50 = vmul.f32 %v881_v43, %v875_v21 }
 0x266   : > { %v964_v1 = vpop.permute.xlu0 %963  ;;  %v966_v13 = vpop.permute.xlu1 %965  ;;  %v846_v16 = vadd.f32 %v842_v36, %v818_v40  ;;  %v847_v18 = vadd.f32 %v843_v38, %v819_v48  ;;  %v889_v58 = vmul.f32 %v885_v44, %v877_v0  ;;  %v939_v2 = vmul.f32 %v934_v8, %v929_v49 }
 0x267   : > { %v940_v5 = vmul.f32 %v938_v37, %v927_v20  ;;  %v892_v12 = vadd.f32 %v888_v50, %v864_v35  ;;  %v957_v30 = vmul.f32 %v2686_v19, %v2626_v46  ;;  %v958_v31 = vmul.f32 %v2704_v41, %v2636_v47 }
 0x268   : > { %v862_v60 = vadd.f32 %v858_v3, %v846_v16  ;;  %v863_v59 = vadd.f32 %v859_v4, %v847_v18  ;;  %v893_v14 = vadd.f32 %v889_v58, %v865_v29  ;;  %v996_v42 = vrot.slane %v991_v22, %v2529_v53 }
 0x269   : > { %v1000_v7 = vrot.slane %v991_v22, %v2535_v55  ;;  %v1012_v36 = vrot.slane %v1007_v45, %v2529_v53  ;;  %v1016_v38 = vrot.slane %v1007_v45, %v2535_v55  ;;  %v1069_v22 = vld [vmem:[#allocation8 + $0xa8] sm:$0xff] }
 0x26a   : > { %v968_v6 = vpop.permute.xlu0 %967  ;;  %v926_v10 = vpop.permute.xlu1 %925  ;;  %v890_v63 = vadd.f32 %v886_v28, %v862_v60  ;;  %v891_v11 = vadd.f32 %v887_v56, %v863_v59  ;;  %v1073_v45 = vld [vmem:[#allocation8 + $0xc8] sm:$0xff] }
 0x26b   : > { %v971_v33 = vsel %vm801_vm5, %v964_v1, %v968_v6  ;;  %v973_v39 = vsel %vm801_vm5, %v968_v6, %v964_v1  ;;  %v928_v43 = vsel %vm760_vm4, %v922_v34, %v926_v10  ;;  %v930_v44 = vsel %vm760_vm4, %v926_v10, %v922_v34 }
 0x26c   : > { %v943_v15 = vadd.f32 %v939_v2, %v890_v63  ;;  %v944_v23 = vadd.f32 %v940_v5, %v891_v11  ;;  %v941_v26 = vmul.f32 %v934_v8, %v930_v44  ;;  %v942_v27 = vmul.f32 %v938_v37, %v928_v43  ;;  %v1064_v63 = vld [vmem:[#allocation8 + $0x80] sm:$0xff]  ;;  %v1065_v11 = vld [vmem:[#allocation8 + $0x88] sm:$0xff]  ;;  %v1050_v44 = vld [vmem:[#allocation8 + $0x10] sm:$0xff] }
 0x26d   : > { %v983_v52 = vmul.f32 %v1586_v51, %v971_v33  ;;  %v984_v24 = vmul.f32 %v1587_v62, %v973_v39  ;;  %v1049_v33 = vld [vmem:[#allocation8 + $0x8] sm:$0xff]  ;;  %v1066_v39 = vld [vmem:[#allocation8 + $0x90] sm:$0xff] }
 0x26e   : > { %v970_v9 = vpop.permute.xlu1 %969  ;;  %v959_v35 = vadd.f32 %v955_v57, %v943_v15  ;;  %v960_v29 = vadd.f32 %v956_v25, %v944_v23  ;;  %v945_v34 = vadd.f32 %v941_v26, %v892_v12  ;;  %v946_v32 = vadd.f32 %v942_v27, %v893_v14  ;;  %v1067_v12 = vld [vmem:[#allocation8 + $0x98] sm:$0xff]  ;;  %v1068_v23 = vld [vmem:[#allocation8 + $0xa0] sm:$0xff] }
 0x26f   : > { %v972_v46 = vsel %vm801_vm5, %v966_v13, %v970_v9  ;;  %v974_v47 = vsel %vm801_vm5, %v970_v9, %v966_v13  ;;  %v1706_v43 = vpack.c.bf16 %v1067_v12, %v1066_v39  ;;  %v1051_v15 = vld [vmem:[#allocation8 + $0x18] sm:$0xff]  ;;  %v1710_v27 = vpack.c.bf16 %v1069_v22, %v1068_v23  ;;  %v1165_v23 = vld [vmem:[#allocation10 + $0x68] sm:$0xff] }
 0x270   : > { %v987_v19 = vadd.f32 %v983_v52, %v959_v35  ;;  %v988_v41 = vadd.f32 %v984_v24, %v960_v29  ;;  %v961_v3 = vadd.f32 %v957_v30, %v945_v34  ;;  %v962_v4 = vadd.f32 %v958_v31, %v946_v32  ;;  %v1052_v30 = vld [vmem:[#allocation8 + $0x20] sm:$0xff]  ;;  %v1053_v31 = vld [vmem:[#allocation8 + $0x28] sm:$0xff]  ;;  %v1070_v52 = vld [vmem:[#allocation8 + $0xb0] sm:$0xff] }
 0x271   : > { %v985_v8 = vmul.f32 %v1586_v51, %v972_v46  ;;  %v986_v37 = vmul.f32 %v1587_v62, %v974_v47  ;;  %v1048_v51 = vld [vmem:[#allocation8] sm:$0xff]  ;;  %v1702_v62 = vpack.c.bf16 %v1065_v11, %v1064_v63  ;;  %v1708_v26 = vpack.c.bf16 %v1051_v15, %v1050_v44  ;;  %v1071_v24 = vld [vmem:[#allocation8 + $0xb8] sm:$0xff]  ;;  %v1054_v32 = vld [vmem:[#allocation8 + $0x30] sm:$0xff] }
 0x272   : > { %v1003_v40 = vmul.f32 %v996_v42, %v987_v19  ;;  %v1004_v48 = vmul.f32 %v1000_v7, %v988_v41  ;;  %v1704_v14 = vpack.c.bf16 %v1049_v33, %v1048_v51  ;;  %v1712_v35 = vpack.c.bf16 %v1053_v31, %v1052_v30  ;;  %v1056_v19 = vld [vmem:[#allocation8 + $0x40] sm:$0xff]  ;;  %v1057_v41 = vld [vmem:[#allocation8 + $0x48] sm:$0xff]  ;;  %v1158_v51 = vld [vmem:[#allocation10 + $0x30] sm:$0xff] }
 0x273   : > { %v989_v54 = vadd.f32 %v985_v8, %v961_v3  ;;  %v990_v17 = vadd.f32 %v986_v37, %v962_v4  ;;  %1703 = vmatprep.subr.bf16.mxu1 %v1702_v62  ;;  %v1714_v34 = vpack.c.bf16 %v1071_v24, %v1070_v52  ;;  %v1074_v3 = vld [vmem:[#allocation8 + $0xd0] sm:$0xff]  ;;  %v1075_v4 = vld [vmem:[#allocation8 + $0xd8] sm:$0xff]  ;;  %v1720_v8 = vpack.c.bf16 %v1057_v41, %v1056_v19  ;;  %v1156_v11 = vld [vmem:[#allocation10 + $0x20] sm:$0xff] }
 0x274   : > { %v2785_v1 = vadd.f32 %v1012_v36, %v1003_v40  ;;  %v2787_v61 = vadd.f32 %v1016_v38, %v1004_v48  ;;  %1705 = vmatpush3.bf16.msra.mxu1 %v1704_v14  ;;  %v1722_v37 = vpack.c.bf16 %v1075_v4, %v1074_v3  ;;  %v1076_v40 = vld [vmem:[#allocation8 + $0xe0] sm:$0xff]  ;;  %v1077_v48 = vld [vmem:[#allocation8 + $0xe8] sm:$0xff]  ;;  %v1163_v33 = vld [vmem:[#allocation10 + $0x58] sm:$0xff]  ;;  %v1740_v39 = vpack.c.bf16 %v1158_v51, %v1156_v11 }
 0x275   : > { %v1005_v21 = vmul.f32 %v996_v42, %v989_v54  ;;  %v1006_v0 = vmul.f32 %v1000_v7, %v990_v17  ;;  %1707 = vmatprep.subr.bf16.mxu1 %v1706_v43  ;;  %v1055_v42 = vld [vmem:[#allocation8 + $0x38] sm:$0xff]  ;;  %v1072_v7 = vld [vmem:[#allocation8 + $0xc0] sm:$0xff]  ;;  %v1726_v17 = vpack.c.bf16 %v1077_v48, %v1076_v40  ;;  %v1161_v62 = vld [vmem:[#allocation10 + $0x48] sm:$0xff] }
 0x276   : > { %v1716_v46 = vpack.c.bf16 %v1055_v42, %v1054_v32  ;;  %v1718_v47 = vpack.c.bf16 %v1073_v45, %v1072_v7  ;;  %v1742_v14 = vpack.c.bf16 %v1163_v33, %v1161_v62  ;;  %v1160_v43 = vld [vmem:[#allocation10 + $0x40] sm:$0xff]  ;;  %v1162_v44 = vld [vmem:[#allocation10 + $0x50] sm:$0xff]  ;;  %v1167_v22 = vld [vmem:[#allocation10 + $0x78] sm:$0xff] }
 0x277   : > { %v2789_v13 = vadd.f32 %v1012_v36, %v1005_v21  ;;  %v2791_v16 = vadd.f32 %v1016_v38, %v1006_v0  ;;  %v1058_v36 = vld [vmem:[#allocation8 + $0x50] sm:$0xff]  ;;  %v1059_v38 = vld [vmem:[#allocation8 + $0x58] sm:$0xff]  ;;  %v1060_v21 = vld [vmem:[#allocation8 + $0x60] sm:$0xff] }
 0x278   : > { %1709 = vmatpush3.bf16.msra.mxu1 %v1708_v26  ;;  %v1724_v54 = vpack.c.bf16 %v1059_v38, %v1058_v36  ;;  %v1061_v0 = vld [vmem:[#allocation8 + $0x68] sm:$0xff]  ;;  %v1744_v26 = vpack.c.bf16 %v1162_v44, %v1160_v43  ;;  %v1164_v30 = vld [vmem:[#allocation10 + $0x60] sm:$0xff]  ;;  %v1166_v31 = vld [vmem:[#allocation10 + $0x70] sm:$0xff] }
 0x279   : > { %v1023_v18 = vadd.f32 %v2789_v13, %v2785_v1  ;;  %v1030_v20 = vadd.f32 %v2791_v16, %v2787_v61  ;;  %1711 = vmatprep.subr.bf16.mxu1 %v1710_v27  ;;  %v1746_v27 = vpack.c.bf16 %v1167_v22, %v1165_v23  ;;  %v1169_v52 = vld [vmem:[#allocation10 + $0x88] sm:$0xff]  ;;  %v1171_v24 = vld [vmem:[#allocation10 + $0x98] sm:$0xff]  ;;  %v1170_v32 = vld [vmem:[#allocation10 + $0x90] sm:$0xff] }
 0x27a   : > { %v1173_v42 = vld [vmem:[#allocation10 + $0xa8] sm:$0xff]  ;;  %v1176_v38 = vld [vmem:[#allocation10 + $0xc0] sm:$0xff]  ;;  %v1178_v40 = vld [vmem:[#allocation10 + $0xd0] sm:$0xff] }
 0x27b   : > { %v1024_v49 = vrot.slane %v1023_v18, 4  ;;  %v1031_v57 = vrot.slane %v1030_v20, 4  ;;  %v1760_v48 = vpack.c.bf16 %v1178_v40, %v1176_v38  ;;  %v1307_v43 = vld [vmem:[#allocation11 + $0x20] sm:$0xff]  ;;  %v1308_v44 = vld [vmem:[#allocation11 + $0x28] sm:$0xff]  ;;  %v1325_v23 = vld [vmem:[#allocation11 + $0xb0] sm:$0xff] }
 0x27c   : > { %1713 = vmatpush3.bf16.msra.mxu1 %v1712_v35  ;;  %v1750_v35 = vpack.c.bf16 %v1171_v24, %v1169_v52  ;;  %v1326_v22 = vld [vmem:[#allocation11 + $0xb8] sm:$0xff]  ;;  %v1327_v52 = vld [vmem:[#allocation11 + $0xc0] sm:$0xff]  ;;  %v1328_v24 = vld [vmem:[#allocation11 + $0xc8] sm:$0xff] }
 0x27d   : > { %v1025_v25 = vadd.f32 %v1024_v49, %v1023_v18  ;;  %v1032_v28 = vadd.f32 %v1031_v57, %v1030_v20  ;;  %1715 = vmatprep.subr.bf16.mxu1 %v1714_v34  ;;  %v1728_v18 = vpack.c.bf16 %v1061_v0, %v1060_v21  ;;  %v1078_v20 = vld [vmem:[#allocation8 + $0xf0] sm:$0xff]  ;;  %v1079_v49 = vld [vmem:[#allocation8 + $0xf8] sm:$0xff]  ;;  %v1168_v34 = vld [vmem:[#allocation10 + $0x80] sm:$0xff] }
 0x27e   : > { %v1730_v57 = vpack.c.bf16 %v1079_v49, %v1078_v20  ;;  %v1752_v7 = vpack.c.bf16 %v1170_v32, %v1168_v34  ;;  %v1180_v0 = vld [vmem:[#allocation10 + $0xe0] sm:$0xff]  ;;  %v1312_v34 = vld [vmem:[#allocation11 + $0x48] sm:$0xff]  ;;  %v1334_v38 = vld [vmem:[#allocation11 + $0xf8] sm:$0xff] }
 0x27f   : > { %v1026_v56 = vrot.slane %v1025_v25, 2  ;;  %v1033_v60 = vrot.slane %v1032_v28, 2  ;;  %v1319_v49 = vld [vmem:[#allocation11 + $0x80] sm:$0xff]  ;;  %v1317_v40 = vld [vmem:[#allocation11 + $0x70] sm:$0xff] }
 0x280   : > { %1717 = vmatpush3.bf16.msra.mxu1 %v1716_v46  ;;  %v1172_v46 = vld [vmem:[#allocation10 + $0xa0] sm:$0xff] }
 0x281   : > { %v1027_v59 = vadd.f32 %v1026_v56, %v1025_v25  ;;  %v1034_v50 = vadd.f32 %v1033_v60, %v1032_v28  ;;  %1719 = vmatprep.subr.bf16.mxu1 %v1718_v47  ;;  %v1062_v25 = vld [vmem:[#allocation8 + $0x70] sm:$0xff]  ;;  %v1063_v28 = vld [vmem:[#allocation8 + $0x78] sm:$0xff]  ;;  %v1153_v60 = vld [vmem:[#allocation10 + $0x8] sm:$0xff] }
 0x282   : > { %v1732_v56 = vpack.c.bf16 %v1063_v28, %v1062_v25  ;;  %v1174_v47 = vld [vmem:[#allocation10 + $0xb0] sm:$0xff]  ;;  %v1303_v25 = vld [vmem:[#allocation11] sm:$0xff] }
 0x283   : > { %v1028_v58 = vrot.slane %v1027_v59, 1  ;;  %v1035_v2 = vrot.slane %v1034_v50, 1  ;;  %v1756_v19 = vpack.c.bf16 %v1174_v47, %v1172_v46  ;;  %v1314_v46 = vld [vmem:[#allocation11 + $0x58] sm:$0xff] }
 0x284   : > { %1721 = vmatpush3.bf16.msra.mxu1 %v1720_v8  ;;  %v1177_v8 = vld [vmem:[#allocation10 + $0xc8] sm:$0xff] }
 0x285   : > { %v1029_v5 = vadd.f32 %v1028_v58, %v1027_v59  ;;  %v1036_v6 = vadd.f32 %v1035_v2, %v1034_v50  ;;  %1723 = vmatprep.subr.bf16.mxu1 %v1722_v37  ;;  %v1155_v59 = vld [vmem:[#allocation10 + $0x18] sm:$0xff]  ;;  %v1152_v50 = vld [vmem:[#allocation10] sm:$0xff]  ;;  %v1154_v2 = vld [vmem:[#allocation10 + $0x10] sm:$0xff] }
 0x286   : > { %v1734_v58 = vpack.c.bf16 %v1155_v59, %v1153_v60  ;;  %v1179_v37 = vld [vmem:[#allocation10 + $0xd8] sm:$0xff]  ;;  %v1321_v60 = vld [vmem:[#allocation11 + $0x90] sm:$0xff] }
 0x287   : > { %v1037_v10 = vadd.f32 %v1036_v6, %v1029_v5  ;;  %v1157_v5 = vld [vmem:[#allocation10 + $0x28] sm:$0xff]  ;;  %v1159_v6 = vld [vmem:[#allocation10 + $0x38] sm:$0xff]  ;;  %v1758_v36 = vpack.c.bf16 %v1179_v37, %v1177_v8 }
 0x288   : > { %1725 = vmatpush3.bf16.msra.mxu1 %v1724_v54  ;;  %v1738_v63 = vpack.c.bf16 %v1159_v6, %v1157_v5  ;;  %1735 = vmatprep.subr.bf16.mxu0 %v1734_v58  ;;  %v1181_v54 = vld [vmem:[#allocation10 + $0xe8] sm:$0xff]  ;;  %v1322_v59 = vld [vmem:[#allocation11 + $0x98] sm:$0xff] }
 0x289   : > { %1038 = vrot.lane.b32.xlu0 %v1037_v10, %s2171_s25  ;;  %1727 = vmatprep.subr.bf16.mxu1 %v1726_v17  ;;  %v1183_v17 = vld [vmem:[#allocation10 + $0xf8] sm:$0xff]  ;;  %v1770_v58 = vpack.c.bf16 %v1322_v59, %v1321_v60  ;;  %v1316_v8 = vld [vmem:[#allocation11 + $0x68] sm:$0xff] }
 0x28a   : > { %v1762_v21 = vpack.c.bf16 %v1183_v17, %v1181_v54  ;;  %v1306_v5 = vld [vmem:[#allocation11 + $0x18] sm:$0xff] }
 0x28b   : > { %v1318_v54 = vld [vmem:[#allocation11 + $0x78] sm:$0xff] }
 0x28c   : > { %1729 = vmatpush3.bf16.msra.mxu1 %v1728_v18  ;;  %v1182_v18 = vld [vmem:[#allocation10 + $0xf0] sm:$0xff]  ;;  %v1796_v17 = vpack.c.bf16 %v1318_v54, %v1317_v40 }
 0x28d   : > { %1731 = vmatprep.subr.bf16.mxu1 %v1730_v57  ;;  %v1764_v20 = vpack.c.bf16 %v1182_v18, %v1180_v0  ;;  %v1320_v57 = vld [vmem:[#allocation11 + $0x88] sm:$0xff] }
 0x28e   : > { %v1766_v28 = vpack.c.bf16 %v1320_v57, %v1319_v49 }
 0x290   : > { %1733 = vmatpush3.bf16.msra.mxu1 %v1732_v56  ;;  %v1304_v56 = vld [vmem:[#allocation11 + $0x8] sm:$0xff] }
 0x291   : > { %1767 = vmatprep.subr.bf16.mxu1 %v1766_v28 }
 0x2fb   : > { %v1039_v9 = vpop.permute.xlu0 %1038 }
 0x2fc   : > { %v2797_v29 = vadd.f32 %v1039_v9, %v1037_v10  ;;  %v1736_v10 = vpack.c.bf16 %v1154_v2, %v1152_v50  ;;  %v1748_v9 = vpack.c.bf16 %v1166_v31, %v1164_v30  ;;  %v1768_v50 = vpack.c.bf16 %v1304_v56, %v1303_v25  ;;  %v1305_v2 = vld [vmem:[#allocation11 + $0x10] sm:$0xff]  ;;  %v1310_v30 = vld [vmem:[#allocation11 + $0x38] sm:$0xff] }
 0x2fd   : > { %v1772_v6 = vpack.c.bf16 %v1306_v5, %v1305_v2 }
 0x2fe   : > { %1041 = vrot.lane.b32.xlu1 %v2797_v29, %s2172_s20  ;;  %1737 = vmatpush1.bf16.msra.mxu0 %v1736_v10  ;;  %s2933_s20 = sld [smem:[#allocation25_spill]] }
 0x2ff   : > { %1739 = vmatprep.subr.bf16.mxu0 %v1738_v63  ;;  %v1080_v63 = vld [vmem:[%s2930_s12] sm:$0x1]  ;;  %s1596_s12 = sshll.u32 %s2272_s19, 8  ;;  %s2173_s19 = smov [#allocation13]  }
 0x302   : > { %1741 = vmatpush1.bf16.msra.mxu0 %v1740_v39  ;;  %v1323_v39 = vld [vmem:[#allocation11 + $0xa0] sm:$0xff] }
 0x303   : > { %1743 = vmatprep.subr.bf16.mxu0 %v1742_v14 }
 0x306   : > { %1745 = vmatpush1.bf16.msra.mxu0 %v1744_v26  ;;  %v1778_v26 = vpack.c.bf16 %v1326_v22, %v1325_v23 }
 0x307   : > { %1747 = vmatprep.subr.bf16.mxu0 %v1746_v27  ;;  %v1309_v27 = vld [vmem:[#allocation11 + $0x30] sm:$0xff] }
 0x308   : > { %v1780_v31 = vpack.c.bf16 %v1310_v30, %v1309_v27 }
 0x30a   : > { %1749 = vmatpush1.bf16.msra.mxu0 %v1748_v9  ;;  %v1782_v9 = vpack.c.bf16 %v1328_v24, %v1327_v52  ;;  %v1589_v24 = vld [vmem:[%s2933_s20] ss:$0 sm:$0xff] }
 0x30b   : > { %1751 = vmatprep.subr.bf16.mxu0 %v1750_v35  ;;  %v1311_v35 = vld [vmem:[#allocation11 + $0x40] sm:$0xff] }
 0x30c   : > { %v1784_v32 = vpack.c.bf16 %v1312_v34, %v1311_v35 }
 0x30e   : > { %1753 = vmatpush1.bf16.msra.mxu0 %v1752_v7 }
 0x370   : > { %v1042_v12 = vpop.permute.xlu1 %1041 }
 0x371   : > { %v1043_v15 = vadd.f32 %v1042_v12, %v2797_v29  ;;  %v1175_v29 = vld [vmem:[#allocation10 + $0xb8] sm:$0xff]  ;;  %v1324_v12 = vld [vmem:[#allocation11 + $0xa8] sm:$0xff] }
 0x372   : > { %v1754_v45 = vpack.c.bf16 %v1175_v29, %v1173_v42  ;;  %v1774_v14 = vpack.c.bf16 %v1324_v12, %v1323_v39  ;;  %v1329_v42 = vld [vmem:[#allocation11 + $0xd0] sm:$0xff]  ;;  %v1330_v29 = vld [vmem:[#allocation11 + $0xd8] sm:$0xff] }
 0x373   : > { %1044 = vrot.lane.b32.xlu0 %v1043_v15, %s2169_s28  ;;  %v1786_v7 = vpack.c.bf16 %v1330_v29, %v1329_v42  ;;  %v1906_v29 = vld [vmem:[%s2502_s23] sm:$0xff] }
 0x374   : > { %1755 = vmatprep.subr.bf16.mxu0 %v1754_v45  ;;  %v1313_v45 = vld [vmem:[#allocation11 + $0x50] sm:$0xff] }
 0x375   : > { %1757 = vmatpush1.bf16.msra.mxu0 %v1756_v19  ;;  %v1788_v47 = vpack.c.bf16 %v1314_v46, %v1313_v45  ;;  %v1331_v19 = vld [vmem:[#allocation11 + $0xe0] sm:$0xff] }
 0x376   : > { %1759 = vmatprep.subr.bf16.mxu0 %v1758_v36  ;;  %v1333_v36 = vld [vmem:[#allocation11 + $0xf0] sm:$0xff] }
 0x379   : > { %1761 = vmatpush1.bf16.msra.mxu0 %v1760_v48  ;;  %v1794_v48 = vpack.c.bf16 %v1334_v38, %v1333_v36 }
 0x37a   : > { %1763 = vmatprep.subr.bf16.mxu0 %v1762_v21  ;;  %v1184_v21 = vld [vmem:[%s2931_s10] sm:$0x3]  ;;  %s2934_s10 = sld [smem:[#allocation26_spill]] }
 0x37b   : > { %v1189_v0 = vrot.slane %v1184_v21, %v2529_v53  ;;  %v1193_v18 = vrot.slane %v1184_v21, %v2535_v55 }
 0x37d   : > { %1765 = vmatpush1.bf16.msra.mxu0 %v1764_v20 }
 0x380   : > { %s2829_s27 = scalar_lea.hbm %s2934_s10, %s1596_s12 }
 0x3e5   : > { %v1045_v41 = vpop.permute.xlu0 %1044 }
 0x3e6   : > { %v1046_v3 = vadd.f32 %v1045_v41, %v1043_v15  ;;  %v1776_v15 = vpack.c.bf16 %v1308_v44, %v1307_v43  ;;  %v1332_v41 = vld [vmem:[#allocation11 + $0xe8] sm:$0xff] }
 0x3e8   : > { %v1047_v4 = vmul.f32 0.00390625, %v1046_v3  ;;  %v1790_v3 = vpack.c.bf16 %v1332_v41, %v1331_v19 }
 0x3ea   : > { %1145 = vmatprep.mubr.f32.mxu1 %v1047_v4 }
 0x3eb   : > { %1146 = vmatmul.mubr.f32.vlgmr.msra.gmra.mrb[0].mxu1 %v1047_v4  ;;  %v1315_v4 = vld [vmem:[#allocation11 + $0x60] sm:$0xff] }
 0x3ec   : > { %1769 = vmatpush3.bf16.msra.mxu1 %v1768_v50  ;;  %v1792_v37 = vpack.c.bf16 %v1316_v8, %v1315_v4 }
 0x3ed   : > { %1771 = vmatprep.subr.bf16.mxu1 %v1770_v58 }
 0x3f0   : > { %1773 = vmatpush3.bf16.msra.mxu1 %v1772_v6 }
 0x3f1   : > { %1775 = vmatprep.subr.bf16.mxu1 %v1774_v14 }
 0x3f4   : > { %1777 = vmatpush3.bf16.msra.mxu1 %v1776_v15 }
 0x3f5   : > { %1779 = vmatprep.subr.bf16.mxu1 %v1778_v26 }
 0x3f8   : > { %1781 = vmatpush3.bf16.msra.mxu1 %v1780_v31  ;;  %v1588_v31 = vld [vmem:[%s2932_s18] ss:$0 sm:$0xff]  ;;  %s2082_s18 = sshll.u32 %s2173_s19, 4  ;;  %s2083_s18 = int_to_ptr.vmem [resolvable:$false] %s2082_s18 }
 0x3f9   : > { %1783 = vmatprep.subr.bf16.mxu1 %v1782_v9  ;;  %s2084_s26 = scalar_lea.vmem %s2083_s18, 512  ;;  %p2085_p11 = scmp.lt.s32.totalorder %s2831_s22, %s2083_s18 }
 0x3fa   : > { %p2086_p12 = scmp.lt.s32.totalorder %s2084_s26, %s2078_s8 }
 0x3fc   : > { %1785 = vmatpush3.bf16.msra.mxu1 %v1784_v32  ;;  %p2087_p13 = por %p2086_p12, %p2085_p11 }
 0x3fd   : > { %1787 = vmatprep.subr.bf16.mxu1 %v1786_v7 }
 0x3fe   : > { %p2088_p8 = pnand %p2087_p13, %p2081_p1 }
 0x400   : > { %1789 = vmatpush3.bf16.msra.mxu1 %v1788_v47  ;;  %v1907_v47 = vld [vmem:[%s2502_s23 + $0x8] sm:$0xff] }
 0x401   : > { %1791 = vmatprep.subr.bf16.mxu1 %v1790_v3 }
 0x404   : > { %1793 = vmatpush3.bf16.msra.mxu1 %v1792_v37 }
 0x405   : > { %1795 = vmatprep.subr.bf16.mxu1 %v1794_v48 }
 0x408   : > { %1797 = vmatpush3.bf16.msra.mxu1 %v1796_v17 }
 0x4be   : > { %v1629_v10 = vpop.f32.mrb[0].mxu1 }
 0x4bf   : > { %v1630_v11 = vpop.f32.mrb[1].mxu1 }
 0x4c0   : > { %v1631_v51 = vadd.f32 %v1630_v11, %v1629_v10 }
 0x4c2   : > { %v1148_v62 = vadd.f32 %v1631_v51, %v1080_v63 }
 0x4c4   : > { %v1151_v33 = vmax.f32 %v1148_v62, 0.0 }
 0x4c6   : > { %1261 = vmatmul.mubr.f32.vlgmr.msra.gmra.mrb[4].mxu0 %v1151_v33 }
 0x599   : > { %v1262_v20 = vpop.f32.mrb[4].mxu0 }
 0x59a   : > { %v1263_v49 = vadd.f32 %v1262_v20, %v1189_v0  ;;  %v1264_v57 = vpop.f32.mrb[5].mxu0 }
 0x59b   : > { %v1265_v25 = vadd.f32 %v1264_v57, %v1193_v18 }
 0x59c   : > { %v1267_v28 = vadd.f32 3.0, %v1263_v49 }
 0x59d   : > { %v1268_v56 = vadd.f32 3.0, %v1265_v25 }
 0x59e   : > { %v1269_v60 = vmax.f32 %v1267_v28, 0.0 }
 0x59f   : > { %v1270_v59 = vmax.f32 %v1268_v56, 0.0 }
 0x5a0   : > { %v1271_v50 = vmin.f32 %v1269_v60, 6.0 }
 0x5a1   : > { %v1272_v58 = vmin.f32 %v1270_v59, 6.0 }
 0x5a2   : > { %v1273_v2 = vmul.f32 0.16666667, %v1271_v50 }
 0x5a3   : > { %v1274_v5 = vmul.f32 0.16666667, %v1272_v58 }
 0x5a4   : > { %v1278_v6 = vrot.slane %v1273_v2, %v2529_v53 }
 0x5a5   : > { %v1282_v10 = vrot.slane %v1274_v5, %v2529_v53 }
 0x5a6   : > { %v1283_v63 = vmul.f32 %v1278_v6, %v2785_v1  ;;  %v1285_v55 = vmul.f32 %v1278_v6, %v2789_v13 }
 0x5a7   : > { %v1284_v11 = vmul.f32 %v1282_v10, %v2787_v61  ;;  %v1286_v51 = vmul.f32 %v1282_v10, %v2791_v16 }
 0x5a8   : > { %v1287_v62 = vadd.f32 3.0, %v1283_v63  ;;  %v1289_v33 = vadd.f32 3.0, %v1285_v55 }
 0x5a9   : > { %v1288_v39 = vadd.f32 3.0, %v1284_v11  ;;  %v1290_v12 = vadd.f32 3.0, %v1286_v51 }
 0x5aa   : > { %v1291_v14 = vmax.f32 %v1287_v62, 0.0  ;;  %v1293_v23 = vmax.f32 %v1289_v33, 0.0 }
 0x5ab   : > { %v1292_v43 = vmax.f32 %v1288_v39, 0.0  ;;  %v1294_v44 = vmax.f32 %v1290_v12, 0.0 }
 0x5ac   : > { %v1295_v15 = vmin.f32 %v1291_v14, 6.0  ;;  %v1297_v1 = vmin.f32 %v1293_v23, 6.0 }
 0x5ad   : > { %v1296_v22 = vmin.f32 %v1292_v43, 6.0  ;;  %v1298_v26 = vmin.f32 %v1294_v44, 6.0 }
 0x5ae   : > { %v1299_v27 = vmul.f32 %v1295_v15, %v1283_v63  ;;  %v1301_v61 = vmul.f32 %v1297_v1, %v1285_v55 }
 0x5af   : > { %v1300_v53 = vmul.f32 %v1296_v22, %v1284_v11  ;;  %v1302_v13 = vmul.f32 %v1298_v26, %v1286_v51 }
 0x5b1   : > { %1399 = vmatprep.mubr.f32.mxu1 %v1300_v53 }
 0x5b2   : > { %1400 = vmatmul.mubr.f32.vlgmr.msra.gmra.mrb[2].mxu1 %v1299_v27 }
 0x5b3   : > { %1404 = vmatprep.mubr.f32.mxu1 %v1302_v13 }
 0x5b6   : > { %1405 = vmatmul.mubr.f32.gmra.mrb[4].mxu1 %v1301_v61 }
 0x685   : > { %v1664_v16 = vpop.f32.mrb[2].mxu1 }
 0x686   : > { %v1665_v30 = vpop.f32.mrb[3].mxu1 }
 0x687   : > { %v1666_v52 = vadd.f32 %v1665_v30, %v1664_v16 }
 0x689   : > { %v1417_v9 = vmul.f32 %v1666_v52, %v1588_v31  ;;  %v1667_v35 = vpop.f32.mrb[4].mxu1 }
 0x68a   : > { %v1668_v34 = vpop.f32.mrb[5].mxu1 }
 0x68b   : > { %v1426_v32 = vadd.f32 %v1589_v24, %v1417_v9  ;;  %v1669_v42 = vadd.f32 %v1668_v34, %v1667_v35 }
 0x68d   : > { %v1428_v7 = vadd.f32 %v1906_v29, %v1426_v32  ;;  %v1418_v45 = vmul.f32 %v1669_v42, %v1588_v31 }
 0x68f   : > { %1430 = vst [vmem:[%s558_s13] sm:$0xff] %v1428_v7  ;;  %v1427_v46 = vadd.f32 %v1589_v24, %v1418_v45 }
 0x691   : > { %v1429_v19 = vadd.f32 %v1907_v47, %v1427_v46 }
 0x693   : > { %1431 = vst [vmem:[%s558_s13 + $0x8] sm:$0xff] %v1429_v19 }
 0x694   : > { %2091 = shalt.err (!%p2088_p8)
}
 0x695   : > { %s2092_s23 = scalar_lea.hbm %s2829_s27, 256  ;;  %s2096_s13 = scalar_lea.hbm %s2934_s10, 512 }
 0x696   : > { %p2093_p6 = scmp.ne.s32.totalorder %s2829_s27, %s2092_s23  ;;  %p2097_p3 = scmp.lt.u32.totalorder %s2829_s27, %s2934_s10 }
 0x697   : > { %p2098_p0 = scmp.lt.u32.totalorder %s2096_s13, %s2092_s23  ;;  %p2100_p2 = scmp.lt.u32.totalorder %s2092_s23, %s2829_s27 }
 0x698   : > { %p2094_p9 = pnand %p2093_p6, %p2935_p7 }
 0x699   : > { %p2099_p5 = por %p2098_p0, %p2097_p3 }
 0x69a   : > { %p2095_p4 = pneg %p2094_p9 }
 0x69b   : > { %p2101_p10 = por %p2100_p2, %p2099_p5 }
 0x69d   : > { %p2102_p1 = pnand %p2101_p10, %p2095_p4 }
 0x69f   : > { %2105 = shalt.err (!%p2102_p1)
}
 0x6a0   : > { %s2174_s1 = smov 128   ;;  %s2175_s8 = smov 8  }
 0x6a1   : > { %1820 = dma.vmem_to_hbm [thread:$0]  (%p2935_p7), %s2831_s22, 256, %s2829_s27, %s1433_s14, %s2174_s1, %s2174_s1, %s2175_s8  }
 0x6a2 PF: > { %s1461_s19 = sand.u32 1, %s2144_s29   ;;  %p2936_p11 = scmp.ne.s32.totalorder %s2920_s17, 0 }
 0x6a3   : > { %p2937_p12 = scmp.ge.s32.totalorder %s2156_s16, 2  ;;  %s1462_s18 = scalar_lea.sflag [#allocation4], %s1461_s19 }
 0x6a5   : > { %p1843_p13 = pnand %p2937_p12, %p2936_p11 }
 0x6a7   : > { %2139 = dma.done.wait (!%p1843_p13), %s1462_s18, 256  }
 0x6a8   : > { %2141 = vsyncadd (!%p1843_p13), %s1462_s18, 4294967040  ;;  %p30_p8 = scmp.ge.s32.totalorder %s2420_s21, 4   ;;  %s2938_s29 = smov %s2148_s30 }
 0x6a9   : > { %s2939_s30 = smov %s2152_s15  ;;  %s2940_s15 = smov %s2432_s6 }
 0x6aa   : > { %s2941_s16 = smov %s2420_s21  ;;  %32 = sbr.rel (!%p30_p8) target bundleno = 17 (0x11), region = 141 }
 0x6b1   :  { %1467 = vsyncpa [#allocation3], 1 }
 0x6b2   :  { %1469 = vsyncpa [#allocation3 + $0x1], 1 }
 0x6b3   :  { %1470 = vsyncpa [#allocation6], 1 }
 0x6b4   :  { %1471 = vsyncpa [#allocation9], 1 }
 0x6b5   :  { %1472 = vsyncpa [#allocation12], 1 }
 0x6b6   :  { %1473 = vsyncpa [#allocation4], 1 }
 0x6b7   :  { %1475 = vsyncpa [#allocation4 + $0x1], 1 }

</bundles_post_ra>
